<compile_context>
chip_gen: v6e
topology: v6e:2x2x1
jax: 0.10.0
libtpu: 0.0.40
codegen_flags: <defaults>
</compile_context>

<pallas_src>
import functools

import jax
import jax.numpy as jnp
from jax.experimental import pallas as pl
from jax.experimental.pallas import tpu as pltpu


def _round_up(x, m):
    return ((x + m - 1) // m) * m


def _round_down(x, m):
    return (x // m) * m


# ---------------------------------------------------------------------------
# Fused kernel: grid = (batch_tiles, seq_tiles); seq is the reduction axis.
#   - accumulate per-input sequence sums in VMEM scratch (f32),
#   - on the last seq step, run the whole MLP head,
#   - weights/biases use constant index_maps -> DMA'd once, VMEM-resident.
# ---------------------------------------------------------------------------
def _fused_kernel(h1_ref, h2_ref,
                  w1a_ref, w1b_ref, s1_ref, t1_ref,
                  w2_ref, s2_ref, t2_ref,
                  w3_ref, b3_ref,
                  o_ref,
                  acc1_ref, acc2_ref,
                  *, seq_rem):
    k = pl.program_id(1)
    nk = pl.num_programs(1)
    ts = h1_ref.shape[1]

    @pl.when(k == 0)
    def _init():
        acc1_ref[...] = jnp.zeros_like(acc1_ref)
        acc2_ref[...] = jnp.zeros_like(acc2_ref)

    def _accumulate(n_rows):
        # f32 accumulation regardless of input dtype.
        if n_rows == ts:
            x1 = h1_ref[...]
            x2 = h2_ref[...]
        else:  # static slice of the partial last tile (skips OOB garbage rows)
            x1 = h1_ref[:, :n_rows, :]
            x2 = h2_ref[:, :n_rows, :]
        acc1_ref[...] += jnp.sum(x1.astype(jnp.float32), axis=1)
        acc2_ref[...] += jnp.sum(x2.astype(jnp.float32), axis=1)

    if seq_rem == 0:
        # S divisible by TS: every tile is full, no masking/branching needed.
        _accumulate(ts)
    else:
        @pl.when(k < nk - 1)
        def _full_tile():
            _accumulate(ts)

        @pl.when(k == nk - 1)
        def _tail_tile():
            _accumulate(seq_rem)

    @pl.when(k == nk - 1)
    def _head():
        # 1/S is folded into s1 host-side, so use the raw sums directly.
        f1 = acc1_ref[...]                                     # (TB, H) f32
        f2 = acc2_ref[...]                                     # (TB, H) f32

        # Layer 1: concat(f1,f2) @ W1  ==  f1 @ W1a + f2 @ W1b   (MXU, f32 acc)
        h1 = jnp.dot(f1, w1a_ref[...], preferred_element_type=jnp.float32)
        h1 = h1 + jnp.dot(f2, w1b_ref[...], preferred_element_type=jnp.float32)
        h1 = h1 * s1_ref[...] + t1_ref[...]                    # mean + bias + BN folded
        h1 = jnp.maximum(h1, 0.0)                              # ReLU

        # Layer 2 (MXU, f32 acc)
        h2 = jnp.dot(h1, w2_ref[...], preferred_element_type=jnp.float32)
        h2 = h2 * s2_ref[...] + t2_ref[...]
        h2 = jnp.maximum(h2, 0.0)

        # Layer 3 (256 -> 1): broadcast-mul + lane reduce on VPU/XLU.
        h3 = jnp.sum(h2 * w3_ref[...], axis=-1, keepdims=True) + b3_ref[...]
        o_ref[...] = jax.nn.sigmoid(h3).astype(o_ref.dtype)


# ---------------------------------------------------------------------------
# Parameter folding (plain JAX glue, done once):
#   BN(scale,shift) after Linear(W,b) on f = acc/S:
#     y = s*((acc/S)@W + b) + t = (acc@W)*(s/S) + (t + s*b)
# ---------------------------------------------------------------------------
def _prepare_params(params, hidden_size, seq_len):
    H = hidden_size
    inv_s = jnp.float32(1.0 / seq_len)

    w1 = params["w1"].astype(jnp.float32)
    w1a = w1[:H]                                             # (H, 1024)
    w1b = w1[H:]                                             # (H, 1024)
    s1 = params["bn1_scale"].astype(jnp.float32) * inv_s     # (1, 1024) incl. 1/S
    t1 = (params["bn1_shift"] + params["bn1_scale"] * params["b1"]).astype(jnp.float32)

    w2 = params["w2"].astype(jnp.float32)                    # (1024, 256)
    s2 = params["bn2_scale"].astype(jnp.float32)             # (1, 256)
    t2 = (params["bn2_shift"] + params["bn2_scale"] * params["b2"]).astype(jnp.float32)

    w3 = params["w3"].reshape(1, -1).astype(jnp.float32)     # (1, 256) row
    b3 = params["b3"].reshape(1, 1).astype(jnp.float32)      # (1, 1)
    return w1a, w1b, s1, t1, w2, s2, t2, w3, b3


# ---------------------------------------------------------------------------
# Full forward: one pallas_call (pool + head fused), no wrapper-side copies.
# ---------------------------------------------------------------------------
def baseline_forward(hidden1, hidden2, params):
    B, S, H = hidden1.shape
    assert hidden2.shape == (B, S, H)
    itemsize = jnp.dtype(hidden1.dtype).itemsize

    w1a, w1b, s1, t1, w2, s2, t2, w3, b3 = _prepare_params(params, H, S)
    D1, D2 = w2.shape  # 1024, 256

    # --- per-generation block budget from physical VMEM -----------------------
    try:
        vmem_cap = int(pltpu.get_tpu_info().vmem_capacity_bytes)
    except Exception:
        vmem_cap = 64 * 1024 * 1024                         # conservative (v7x)
    if vmem_cap >= 128 * 1024 * 1024:                       # v5e / v6e
        blk_budget = 12 * 1024 * 1024                       # per hidden-state block
    else:                                                   # v7x (64 MiB / TC)
        blk_budget = 7 * 1024 * 1024

    # --- batch tile: <= B, multiple of 8, and >= 2 tiles when B >= 16 so the
    #     "parallel" batch axis spans both TensorCores on v7x -------------------
    if B <= 8:
        TB = B
    else:
        TB = min(256, max(8, _round_down(B // 2, 8)))
    nb = pl.cdiv(B, TB)

    # --- seq tile: full S if it fits, else a multiple of 16 within the budget;
    #     partial last tile handled in-kernel (static slice), never padded ------
    row_bytes = TB * H * itemsize
    ts_budget = max(16, _round_down(blk_budget // max(1, row_bytes), 16))
    TS = S if S <= ts_budget else ts_budget
    nk = pl.cdiv(S, TS)
    seq_rem = S % TS

    # --- VMEM limit: what we actually need (double-buffered blocks + weights) --
    weight_bytes = 4 * (w1a.size + w1b.size + w2.size
                        + s1.size + t1.size + s2.size + t2.size + w3.size + b3.size)
    block_bytes = TB * TS * H * itemsize
    need = (2 * 2 * block_bytes          # 2 inputs x 2 pipeline buffers
            + 2 * weight_bytes           # weights (double-buffered by default)
            + 2 * TB * H * 4             # f32 accumulators
            + 2 * TB * 4                 # output
            + (2 << 20))                 # slack
    vmem_limit = int(min(vmem_cap * 3 // 4,
                         max(32 * 1024 * 1024, _round_up(need, 1 << 20))))

    grid = (nb, nk)
    hspec = pl.BlockSpec((TB, TS, H), lambda i, k: (i, k, 0))

    def wspec(shape):
        # constant index_map -> fetched once, stays VMEM-resident across the grid
        return pl.BlockSpec(shape, lambda i, k: (0, 0))

    out_rows = nb * TB  # padded rows (garbage from partial batch tiles) sliced off

    flops = (2 * B * S * H                                   # pooling adds (2 inputs)
             + 2 * B * (2 * H * D1 + D1 * D2 + D2))          # head matmuls
    bytes_accessed = (2 * B * S * H * itemsize               # hidden states (once)
                      + weight_bytes
                      + out_rows * 4)
    cost = pl.CostEstimate(flops=flops, transcendentals=B,
                           bytes_accessed=bytes_accessed)

    out = pl.pallas_call(
        functools.partial(_fused_kernel, seq_rem=seq_rem),
        out_shape=jax.ShapeDtypeStruct((out_rows, 1), jnp.float32),
        grid_spec=pltpu.PrefetchScalarGridSpec(
            num_scalar_prefetch=0,
            grid=grid,
            in_specs=[
                hspec, hspec,                                # hidden1, hidden2
                wspec((H, D1)), wspec((H, D1)),              # w1a, w1b
                wspec((1, D1)), wspec((1, D1)),              # s1 (incl. 1/S), t1
                wspec((D1, D2)),                             # w2
                wspec((1, D2)), wspec((1, D2)),              # s2, t2
                wspec((1, D2)), wspec((1, 1)),               # w3 row, b3
            ],
            out_specs=pl.BlockSpec((TB, 1), lambda i, k: (i, 0)),
            scratch_shapes=[pltpu.VMEM((TB, H), jnp.float32),
                            pltpu.VMEM((TB, H), jnp.float32)],
        ),
        compiler_params=pltpu.CompilerParams(
            dimension_semantics=("parallel", "arbitrary"),   # batch shards across TCs
            vmem_limit_bytes=vmem_limit,
        ),
        cost_estimate=cost,
    )(hidden1, hidden2, w1a, w1b, s1, t1, w2, s2, t2, w3, b3)

    return out[:B]


# ---------------------------------------------------------------------------
# Deterministic parameter construction (shapes from the module's __init__).
# BatchNorm (inference): scale = gamma / sqrt(var + eps), shift = beta - mean*scale
# ---------------------------------------------------------------------------
def make_params(hidden_size, key):
    ks = jax.random.split(key, 12)
    d_in = hidden_size * 2

    def lin(k, fan_in, fan_out):
        kw, kb = jax.random.split(k)
        lim = 1.0 / jnp.sqrt(fan_in)
        w = jax.random.uniform(kw, (fan_in, fan_out), jnp.float32, -lim, lim)
        b = jax.random.uniform(kb, (1, fan_out), jnp.float32, -lim, lim)
        return w, b

    w1, b1 = lin(ks[0], d_in, 1024)
    w2, b2 = lin(ks[1], 1024, 256)
    w3, b3 = lin(ks[2], 256, 1)

    eps = 1e-5

    def bn(kg, kb, km, kv, n):
        gamma = 1.0 + 0.1 * jax.random.normal(kg, (1, n), jnp.float32)
        beta = 0.1 * jax.random.normal(kb, (1, n), jnp.float32)
        r_mean = 0.1 * jax.random.normal(km, (1, n), jnp.float32)
        r_var = jnp.abs(1.0 + 0.1 * jax.random.normal(kv, (1, n), jnp.float32))
        scale = gamma * jax.lax.rsqrt(r_var + eps)
        shift = beta - r_mean * scale
        return scale, shift

    bn1_scale, bn1_shift = bn(ks[3], ks[4], ks[5], ks[6], 1024)
    bn2_scale, bn2_shift = bn(ks[7], ks[8], ks[9], ks[10], 256)

    return dict(
        w1=w1, b1=b1, bn1_scale=bn1_scale, bn1_shift=bn1_shift,
        w2=w2, b2=b2, bn2_scale=bn2_scale, bn2_shift=bn2_shift,
        w3=w3, b3=b3,
    )


if __name__ == "__main__":
    key = jax.random.PRNGKey(0)
    k1, k2, kp = jax.random.split(key, 3)

    B, S, H = 2, 8, 32   # small synthetic shapes (hidden_size=32 stand-in for 320)

    hidden1 = jax.random.normal(k1, (B, S, H), jnp.float32)  # "last_hidden_state" of seq1
    hidden2 = jax.random.normal(k2, (B, S, H), jnp.float32)  # "last_hidden_state" of seq2
    params = make_params(H, kp)

    out = baseline_forward(hidden1, hidden2, params)
    out = jax.block_until_ready(out)
    assert out.shape == (B, 1)
    assert bool(jnp.all((out >= 0.0) & (out <= 1.0)))
    print("KERNEL_OK")
</pallas_src>

<mosaic_0001>
module attributes {stable_mosaic.version = 11 : i64} {
  func.func @_fused_kernel(%arg0: i32, %arg1: i32, %arg2: memref<2x8x32xf32, #tpu.memory_space<vmem>>, %arg3: memref<2x8x32xf32, #tpu.memory_space<vmem>>, %arg4: memref<32x1024xf32, #tpu.memory_space<vmem>>, %arg5: memref<32x1024xf32, #tpu.memory_space<vmem>>, %arg6: memref<1x1024xf32, #tpu.memory_space<vmem>>, %arg7: memref<1x1024xf32, #tpu.memory_space<vmem>>, %arg8: memref<1024x256xf32, #tpu.memory_space<vmem>>, %arg9: memref<1x256xf32, #tpu.memory_space<vmem>>, %arg10: memref<1x256xf32, #tpu.memory_space<vmem>>, %arg11: memref<1x256xf32, #tpu.memory_space<vmem>>, %arg12: memref<1x1xf32, #tpu.memory_space<vmem>>, %arg13: memref<2x1xf32, #tpu.memory_space<vmem>>, %arg14: memref<2x32xf32, #tpu.memory_space<vmem>>, %arg15: memref<2x32xf32, #tpu.memory_space<vmem>>) attributes {dimension_semantics = [#tpu.dimension_semantics<parallel>, #tpu.dimension_semantics<arbitrary>], iteration_bounds = array<i64: 1, 1>, scalar_prefetch = 0 : i64, scratch_operands = 2 : i64, tpu.core_type = #tpu.core_type<tc>, window_params = [{transform_indices = @transform_0, window_bounds = array<i64: 2, 8, 32>}, {transform_indices = @transform_1, window_bounds = array<i64: 2, 8, 32>}, {pipeline_mode = #tpu.pipeline_mode<synchronous>, transform_indices = @transform_2, window_bounds = array<i64: 32, 1024>}, {pipeline_mode = #tpu.pipeline_mode<synchronous>, transform_indices = @transform_3, window_bounds = array<i64: 32, 1024>}, {pipeline_mode = #tpu.pipeline_mode<synchronous>, transform_indices = @transform_4, window_bounds = array<i64: 1, 1024>}, {pipeline_mode = #tpu.pipeline_mode<synchronous>, transform_indices = @transform_5, window_bounds = array<i64: 1, 1024>}, {pipeline_mode = #tpu.pipeline_mode<synchronous>, transform_indices = @transform_6, window_bounds = array<i64: 1024, 256>}, {pipeline_mode = #tpu.pipeline_mode<synchronous>, transform_indices = @transform_7, window_bounds = array<i64: 1, 256>}, {pipeline_mode = #tpu.pipeline_mode<synchronous>, transform_indices = @transform_8, window_bounds = array<i64: 1, 256>}, {pipeline_mode = #tpu.pipeline_mode<synchronous>, transform_indices = @transform_9, window_bounds = array<i64: 1, 256>}, {pipeline_mode = #tpu.pipeline_mode<synchronous>, transform_indices = @transform_10, window_bounds = array<i64: 1, 1>}, {transform_indices = @transform_11, window_bounds = array<i64: 2, 1>}]} {
    %c0_i32 = arith.constant 0 : i32
    %0 = arith.cmpi eq, %arg1, %c0_i32 : i32
    %1 = arith.extui %0 : i1 to i32
    %c0_i32_0 = arith.constant 0 : i32
    %2 = arith.cmpi ne, %1, %c0_i32_0 : i32
    scf.if %2 {
      %cst_17 = arith.constant 0.000000e+00 : f32
      %16 = vector.broadcast %cst_17 : f32 to vector<2x32xf32>
      %c0_18 = arith.constant 0 : index
      %c0_19 = arith.constant 0 : index
      %17 = vector.load %arg14[%c0_18, %c0_19] : memref<2x32xf32, #tpu.memory_space<vmem>>, vector<2x32xf32>
      tpu.vector_store %arg14[%c0_18, %c0_19], %16 {strides = array<i32>} : memref<2x32xf32, #tpu.memory_space<vmem>>, vector<2x32xf32>,
      %cst_20 = arith.constant 0.000000e+00 : f32
      %18 = vector.broadcast %cst_20 : f32 to vector<2x32xf32>
      %c0_21 = arith.constant 0 : index
      %c0_22 = arith.constant 0 : index
      %19 = vector.load %arg15[%c0_21, %c0_22] : memref<2x32xf32, #tpu.memory_space<vmem>>, vector<2x32xf32>
      tpu.vector_store %arg15[%c0_21, %c0_22], %18 {strides = array<i32>} : memref<2x32xf32, #tpu.memory_space<vmem>>, vector<2x32xf32>,
    } else {
    }
    %c0 = arith.constant 0 : index
    %c0_1 = arith.constant 0 : index
    %c0_2 = arith.constant 0 : index
    %3 = vector.load %arg2[%c0, %c0_1, %c0_2] : memref<2x8x32xf32, #tpu.memory_space<vmem>>, vector<2x8x32xf32>
    %c0_3 = arith.constant 0 : index
    %c0_4 = arith.constant 0 : index
    %c0_5 = arith.constant 0 : index
    %4 = vector.load %arg3[%c0_3, %c0_4, %c0_5] : memref<2x8x32xf32, #tpu.memory_space<vmem>>, vector<2x8x32xf32>
    %c0_6 = arith.constant 0 : index
    %c0_7 = arith.constant 0 : index
    %5 = vector.load %arg14[%c0_6, %c0_7] : memref<2x32xf32, #tpu.memory_space<vmem>>, vector<2x32xf32>
    %cst = arith.constant dense<0.000000e+00> : vector<2x32xf32>
    %6 = vector.multi_reduction <add>, %3, %cst [1] : vector<2x8x32xf32> to vector<2x32xf32>
    %7 = arith.addf %5, %6 : vector<2x32xf32>
    %c0_8 = arith.constant 0 : index
    %c0_9 = arith.constant 0 : index
    %8 = vector.load %arg14[%c0_8, %c0_9] : memref<2x32xf32, #tpu.memory_space<vmem>>, vector<2x32xf32>
    tpu.vector_store %arg14[%c0_8, %c0_9], %7 {strides = array<i32>} : memref<2x32xf32, #tpu.memory_space<vmem>>, vector<2x32xf32>,
    %c0_10 = arith.constant 0 : index
    %c0_11 = arith.constant 0 : index
    %9 = vector.load %arg15[%c0_10, %c0_11] : memref<2x32xf32, #tpu.memory_space<vmem>>, vector<2x32xf32>
    %cst_12 = arith.constant dense<0.000000e+00> : vector<2x32xf32>
    %10 = vector.multi_reduction <add>, %4, %cst_12 [1] : vector<2x8x32xf32> to vector<2x32xf32>
    %11 = arith.addf %9, %10 : vector<2x32xf32>
    %c0_13 = arith.constant 0 : index
    %c0_14 = arith.constant 0 : index
    %12 = vector.load %arg15[%c0_13, %c0_14] : memref<2x32xf32, #tpu.memory_space<vmem>>, vector<2x32xf32>
    tpu.vector_store %arg15[%c0_13, %c0_14], %11 {strides = array<i32>} : memref<2x32xf32, #tpu.memory_space<vmem>>, vector<2x32xf32>,
    %c0_i32_15 = arith.constant 0 : i32
    %13 = arith.cmpi eq, %arg1, %c0_i32_15 : i32
    %14 = arith.extui %13 : i1 to i32
    %c0_i32_16 = arith.constant 0 : i32
    %15 = arith.cmpi ne, %14, %c0_i32_16 : i32
    scf.if %15 {
      %c0_17 = arith.constant 0 : index
      %c0_18 = arith.constant 0 : index
      %16 = vector.load %arg14[%c0_17, %c0_18] : memref<2x32xf32, #tpu.memory_space<vmem>>, vector<2x32xf32>
      %c0_19 = arith.constant 0 : index
      %c0_20 = arith.constant 0 : index
      %17 = vector.load %arg15[%c0_19, %c0_20] : memref<2x32xf32, #tpu.memory_space<vmem>>, vector<2x32xf32>
      %c0_21 = arith.constant 0 : index
      %c0_22 = arith.constant 0 : index
      %18 = vector.load %arg4[%c0_21, %c0_22] : memref<32x1024xf32, #tpu.memory_space<vmem>>, vector<32x1024xf32>
      %cst_23 = arith.constant dense<0.000000e+00> : vector<2x1024xf32>
      %19 = tpu.matmul %16, %18, %cst_23 {dimension_numbers = #tpu.dot_dimension_numbers<[1], [0], [0], [1], [0, 0, 1, 1], [], []>} : vector<2x32xf32>, vector<32x1024xf32>, vector<2x1024xf32> -> vector<2x1024xf32>
      %c0_24 = arith.constant 0 : index
      %c0_25 = arith.constant 0 : index
      %20 = vector.load %arg5[%c0_24, %c0_25] : memref<32x1024xf32, #tpu.memory_space<vmem>>, vector<32x1024xf32>
      %cst_26 = arith.constant dense<0.000000e+00> : vector<2x1024xf32>
      %21 = tpu.matmul %17, %20, %cst_26 {dimension_numbers = #tpu.dot_dimension_numbers<[1], [0], [0], [1], [0, 0, 1, 1], [], []>} : vector<2x32xf32>, vector<32x1024xf32>, vector<2x1024xf32> -> vector<2x1024xf32>
      %22 = arith.addf %19, %21 : vector<2x1024xf32>
      %c0_27 = arith.constant 0 : index
      %c0_28 = arith.constant 0 : index
      %23 = vector.load %arg6[%c0_27, %c0_28] : memref<1x1024xf32, #tpu.memory_space<vmem>>, vector<1x1024xf32>
      %24 = vector.broadcast %23 : vector<1x1024xf32> to vector<2x1024xf32>
      %25 = arith.mulf %22, %24 : vector<2x1024xf32>
      %c0_29 = arith.constant 0 : index
      %c0_30 = arith.constant 0 : index
      %26 = vector.load %arg7[%c0_29, %c0_30] : memref<1x1024xf32, #tpu.memory_space<vmem>>, vector<1x1024xf32>
      %27 = vector.broadcast %26 : vector<1x1024xf32> to vector<2x1024xf32>
      %28 = arith.addf %25, %27 : vector<2x1024xf32>
      %cst_31 = arith.constant 0.000000e+00 : f32
      %29 = vector.broadcast %cst_31 : f32 to vector<2x1024xf32>
      %30 = arith.maximumf %28, %29 : vector<2x1024xf32>
      %c0_32 = arith.constant 0 : index
      %c0_33 = arith.constant 0 : index
      %31 = vector.load %arg8[%c0_32, %c0_33] : memref<1024x256xf32, #tpu.memory_space<vmem>>, vector<1024x256xf32>
      %cst_34 = arith.constant dense<0.000000e+00> : vector<2x256xf32>
      %32 = tpu.matmul %30, %31, %cst_34 {dimension_numbers = #tpu.dot_dimension_numbers<[1], [0], [0], [1], [0, 0, 1, 1], [], []>} : vector<2x1024xf32>, vector<1024x256xf32>, vector<2x256xf32> -> vector<2x256xf32>
      %c0_35 = arith.constant 0 : index
      %c0_36 = arith.constant 0 : index
      %33 = vector.load %arg9[%c0_35, %c0_36] : memref<1x256xf32, #tpu.memory_space<vmem>>, vector<1x256xf32>
      %34 = vector.broadcast %33 : vector<1x256xf32> to vector<2x256xf32>
      %35 = arith.mulf %32, %34 : vector<2x256xf32>
      %c0_37 = arith.constant 0 : index
      %c0_38 = arith.constant 0 : index
      %36 = vector.load %arg10[%c0_37, %c0_38] : memref<1x256xf32, #tpu.memory_space<vmem>>, vector<1x256xf32>
      %37 = vector.broadcast %36 : vector<1x256xf32> to vector<2x256xf32>
      %38 = arith.addf %35, %37 : vector<2x256xf32>
      %cst_39 = arith.constant 0.000000e+00 : f32
      %39 = vector.broadcast %cst_39 : f32 to vector<2x256xf32>
      %40 = arith.maximumf %38, %39 : vector<2x256xf32>
      %c0_40 = arith.constant 0 : index
      %c0_41 = arith.constant 0 : index
      %41 = vector.load %arg11[%c0_40, %c0_41] : memref<1x256xf32, #tpu.memory_space<vmem>>, vector<1x256xf32>
      %42 = vector.broadcast %41 : vector<1x256xf32> to vector<2x256xf32>
      %43 = arith.mulf %40, %42 : vector<2x256xf32>
      %cst_42 = arith.constant dense<0.000000e+00> : vector<2xf32>
      %44 = vector.multi_reduction <add>, %43, %cst_42 [1] : vector<2x256xf32> to vector<2xf32>
      %45 = vector.shape_cast %44 : vector<2xf32> to vector<2x1xf32>
      %c0_43 = arith.constant 0 : index
      %c0_44 = arith.constant 0 : index
      %46 = vector.load %arg12[%c0_43, %c0_44] : memref<1x1xf32, #tpu.memory_space<vmem>>, vector<1x1xf32>
      %47 = vector.broadcast %46 : vector<1x1xf32> to vector<2x1xf32>
      %48 = arith.addf %45, %47 : vector<2x1xf32>
      %49 = arith.negf %48 : vector<2x1xf32>
      %50 = math.exp %49 : vector<2x1xf32>
      %cst_45 = arith.constant 1.000000e+00 : f32
      %51 = vector.broadcast %cst_45 : f32 to vector<2x1xf32>
      %52 = arith.addf %51, %50 : vector<2x1xf32>
      %53 = arith.divf %51, %52 : vector<2x1xf32>
      %c0_46 = arith.constant 0 : index
      %c0_47 = arith.constant 0 : index
      %54 = vector.load %arg13[%c0_46, %c0_47] : memref<2x1xf32, #tpu.memory_space<vmem>>, vector<2x1xf32>
      tpu.vector_store %arg13[%c0_46, %c0_47], %53 {strides = array<i32>} : memref<2x1xf32, #tpu.memory_space<vmem>>, vector<2x1xf32>,
    } else {
    }
    return
  }
  func.func @transform_0(%arg0: i32, %arg1: i32) -> (i32, i32, i32) {
    %c0_i32 = arith.constant 0 : i32
    %c0_i32_0 = arith.constant 0 : i32
    return %arg0, %arg1, %c0_i32 : i32, i32, i32
  }
  func.func @transform_1(%arg0: i32, %arg1: i32) -> (i32, i32, i32) {
    %c0_i32 = arith.constant 0 : i32
    %c0_i32_0 = arith.constant 0 : i32
    return %arg0, %arg1, %c0_i32 : i32, i32, i32
  }
  func.func @transform_2(%arg0: i32, %arg1: i32) -> (i32, i32) {
    %c0_i32 = arith.constant 0 : i32
    %c0_i32_0 = arith.constant 0 : i32
    %c0_i32_1 = arith.constant 0 : i32
    return %c0_i32, %c0_i32_0 : i32, i32
  }
  func.func @transform_3(%arg0: i32, %arg1: i32) -> (i32, i32) {
    %c0_i32 = arith.constant 0 : i32
    %c0_i32_0 = arith.constant 0 : i32
    %c0_i32_1 = arith.constant 0 : i32
    return %c0_i32, %c0_i32_0 : i32, i32
  }
  func.func @transform_4(%arg0: i32, %arg1: i32) -> (i32, i32) {
    %c0_i32 = arith.constant 0 : i32
    %c0_i32_0 = arith.constant 0 : i32
    %c0_i32_1 = arith.constant 0 : i32
    return %c0_i32, %c0_i32_0 : i32, i32
  }
  func.func @transform_5(%arg0: i32, %arg1: i32) -> (i32, i32) {
    %c0_i32 = arith.constant 0 : i32
    %c0_i32_0 = arith.constant 0 : i32
    %c0_i32_1 = arith.constant 0 : i32
    return %c0_i32, %c0_i32_0 : i32, i32
  }
  func.func @transform_6(%arg0: i32, %arg1: i32) -> (i32, i32) {
    %c0_i32 = arith.constant 0 : i32
    %c0_i32_0 = arith.constant 0 : i32
    %c0_i32_1 = arith.constant 0 : i32
    return %c0_i32, %c0_i32_0 : i32, i32
  }
  func.func @transform_7(%arg0: i32, %arg1: i32) -> (i32, i32) {
    %c0_i32 = arith.constant 0 : i32
    %c0_i32_0 = arith.constant 0 : i32
    %c0_i32_1 = arith.constant 0 : i32
    return %c0_i32, %c0_i32_0 : i32, i32
  }
  func.func @transform_8(%arg0: i32, %arg1: i32) -> (i32, i32) {
    %c0_i32 = arith.constant 0 : i32
    %c0_i32_0 = arith.constant 0 : i32
    %c0_i32_1 = arith.constant 0 : i32
    return %c0_i32, %c0_i32_0 : i32, i32
  }
  func.func @transform_9(%arg0: i32, %arg1: i32) -> (i32, i32) {
    %c0_i32 = arith.constant 0 : i32
    %c0_i32_0 = arith.constant 0 : i32
    %c0_i32_1 = arith.constant 0 : i32
    return %c0_i32, %c0_i32_0 : i32, i32
  }
  func.func @transform_10(%arg0: i32, %arg1: i32) -> (i32, i32) {
    %c0_i32 = arith.constant 0 : i32
    %c0_i32_0 = arith.constant 0 : i32
    %c0_i32_1 = arith.constant 0 : i32
    return %c0_i32, %c0_i32_0 : i32, i32
  }
  func.func @transform_11(%arg0: i32, %arg1: i32) -> (i32, i32) {
    %c0_i32 = arith.constant 0 : i32
    %c0_i32_0 = arith.constant 0 : i32
    return %arg0, %c0_i32 : i32, i32
  }
}

</mosaic_0001>

<bundles_post_ra>
// kernel: tpu_custom_call.1
= control target key start
LH: loop header
LB: loop body
LE: loop exit
PB: predicated region body
PF: predicated region fallthrough
CT: control target
= control target key end

     0   :  { %s1895_s0 = inlined_call_operand.hbm [shape: f32[2,8,32], index: 0, kind: input, shape index: {}]   ;;  %s1896_s1 = inlined_call_operand.hbm [shape: f32[2,8,32], index: 1, kind: input, shape index: {}]   ;;  %s1897_s2 = inlined_call_operand.hbm [shape: f32[32,1024], index: 2, kind: input, shape index: {}]   ;;  %s1898_s3 = inlined_call_operand.hbm [shape: f32[32,1024], index: 3, kind: input, shape index: {}]   ;;  %s1899_s4 = inlined_call_operand.vmem [shape: f32[1,1024], index: 4, kind: input, shape index: {}]   ;;  %s1900_s5 = inlined_call_operand.hbm [shape: f32[1,1024], index: 5, kind: input, shape index: {}]   ;;  %s1901_s6 = inlined_call_operand.hbm [shape: f32[1024,256], index: 6, kind: input, shape index: {}]   ;;  %s1902_s7 = inlined_call_operand.vmem [shape: f32[1,256], index: 7, kind: input, shape index: {}]   ;;  %s1903_s8 = inlined_call_operand.vmem [shape: f32[1,256], index: 8, kind: input, shape index: {}]   ;;  %s1904_s9 = inlined_call_operand.vmem [shape: f32[1,256], index: 9, kind: input, shape index: {}]   ;;  %s1905_s10 = inlined_call_operand.<no memory space> [shape: f32[1,1], index: 10, kind: input, shape index: {}]   ;;  %s1906_s11 = inlined_call_operand.vmem [shape: f32[2,1], index: 11, kind: output, shape index: {}]  }
   0x1   :  { %v16_v0 = vstv %s1905_s10 }
   0x2   :  { %17 = vst [vmem:[#allocation4] sm:$0x1] %v16_v0 }
   0x3   :  { %18 = vsyncpa [#allocation6], 0 }
   0x4   :  { %19 = vsyncpa [#allocation8], 0 }
   0x5   :  { %20 = vsyncpa [#allocation11], 0 }
   0x6   :  { %21 = vsyncpa [#allocation14], 0  ;;  %s1696_s19 = smov [#allocation7]  }
   0x7   :  { %s39_s20 = sshll.u32 %s1696_s19, 4  ;;  %s40_s20 = int_to_ptr.vmem [resolvable:$true] %s39_s20 }
   0x8   :  { %s1576_s21 = scalar_lea.vmem %s40_s20, 256  ;;  %p1581_p1 = scmp.lt.s32.totalorder %s40_s20, %s40_s20 }
   0x9   :  { %p1577_p0 = scmp.ne.s32.totalorder %s40_s20, %s1576_s21  ;;  %p1582_p2 = scmp.lt.s32.totalorder %s1576_s21, %s1576_s21 }
   0xb   :  { %p1583_p3 = por %p1582_p2, %p1581_p1 }
   0xd   :  { %p1584_p4 = pnand %p1583_p3, %p1577_p0 }
   0xf   :  { %1587 = shalt.err (!%p1584_p4)
}
  0x10   :  { %s1697_s22 = smov 128   ;;  %s1698_s23 = smov 8  }
  0x11   :  { %45 = dma.hbm_to_vmem [thread:$0]  %s1896_s1, 256, %s40_s20, [#allocation8], %s1697_s22, %s1697_s22, %s1698_s23  }
  0x12   :  { %s1699_s10 = smov [#allocation10]   ;;  %s1700_s27 = smov [#allocation5]  }
  0x13   :  { %s63_s26 = sshll.u32 %s1699_s10, 4  ;;  %s27_s28 = sshll.u32 %s1700_s27, 4  ;;  %s64_s26 = int_to_ptr.vmem [resolvable:$true] %s63_s26  ;;  %s28_s28 = int_to_ptr.vmem [resolvable:$true] %s27_s28 }
  0x14   :  { %s1596_s29 = scalar_lea.vmem %s64_s26, 4096  ;;  %p1601_p6 = scmp.lt.s32.totalorder %s64_s26, %s64_s26 }
  0x15   :  { %p1597_p5 = scmp.ne.s32.totalorder %s64_s26, %s1596_s29  ;;  %p1602_p7 = scmp.lt.s32.totalorder %s1596_s29, %s1596_s29 }
  0x17   :  { %p1603_p8 = por %p1602_p7, %p1601_p6 }
  0x19   :  { %p1604_p9 = pnand %p1603_p8, %p1597_p5 }
  0x1b   :  { %1607 = shalt.err (!%p1604_p9)
}
  0x1c   :  { %s1701_s30 = smov 1024   ;;  %s1702_s12 = smov 64  }
  0x1d   :  { %69 = dma.hbm_to_vmem [thread:$0]  %s1898_s3, 4096, %s64_s26, [#allocation11], %s1701_s30, %s1701_s30, %s1702_s12  }
  0x1e   :  { %s1616_s1 = scalar_lea.vmem %s28_s28, 256  ;;  %p1621_p11 = scmp.lt.s32.totalorder %s28_s28, %s28_s28 }
  0x1f   :  { %p1617_p10 = scmp.ne.s32.totalorder %s28_s28, %s1616_s1  ;;  %p1622_p12 = scmp.lt.s32.totalorder %s1616_s1, %s1616_s1 }
  0x21   :  { %p1623_p13 = por %p1622_p12, %p1621_p11 }
  0x23   :  { %p1624_p0 = pnand %p1623_p13, %p1617_p10 }
  0x25   :  { %1627 = shalt.err (!%p1624_p0)
}
  0x26   :  { %33 = dma.hbm_to_vmem [thread:$0]  %s1895_s0, 256, %s28_s28, [#allocation6], %s1697_s22, %s1697_s22, %s1698_s23  }
  0x27   :  { %s1703_s17 = smov [#allocation9]   ;;  %s1704_s19 = smov [#allocation12]  }
  0x28   :  { %s51_s18 = sshll.u32 %s1703_s17, 4  ;;  %s78_s20 = sshll.u32 %s1704_s19, 4  ;;  %s52_s18 = int_to_ptr.vmem [resolvable:$true] %s51_s18  ;;  %s79_s20 = int_to_ptr.vmem [resolvable:$true] %s78_s20 }
  0x29   :  { %s1636_s21 = scalar_lea.vmem %s52_s18, 4096  ;;  %p1641_p2 = scmp.lt.s32.totalorder %s52_s18, %s52_s18 }
  0x2a   :  { %p1637_p1 = scmp.ne.s32.totalorder %s52_s18, %s1636_s21  ;;  %p1642_p3 = scmp.lt.s32.totalorder %s1636_s21, %s1636_s21 }
  0x2c   :  { %p1643_p4 = por %p1642_p3, %p1641_p2 }
  0x2e   :  { %p1644_p5 = pnand %p1643_p4, %p1637_p1 }
  0x30   :  { %1647 = shalt.err (!%p1644_p5)
}
  0x31   :  { %57 = dma.hbm_to_vmem [thread:$0]  %s1897_s2, 4096, %s52_s18, [#allocation8], %s1701_s30, %s1701_s30, %s1702_s12  }
  0x32   :  { %s1656_s25 = scalar_lea.vmem %s79_s20, 128  ;;  %p1661_p7 = scmp.lt.s32.totalorder %s79_s20, %s79_s20 }
  0x33   :  { %p1657_p6 = scmp.ne.s32.totalorder %s79_s20, %s1656_s25  ;;  %p1662_p8 = scmp.lt.s32.totalorder %s1656_s25, %s1656_s25 }
  0x35   :  { %p1663_p9 = por %p1662_p8, %p1661_p7 }
  0x37   :  { %p1664_p10 = pnand %p1663_p9, %p1657_p6 }
  0x39   :  { %1667 = shalt.err (!%p1664_p10)
}
  0x3a   :  { %81 = dma.hbm_to_vmem [thread:$0]  %s1900_s5, 128, %s79_s20, [#allocation11]  }
  0x3b   :  { %s1705_s23 = smov [#allocation13]  }
  0x3c   :  { %s87_s10 = sshll.u32 %s1705_s23, 4  ;;  %s88_s10 = int_to_ptr.vmem [resolvable:$true] %s87_s10 }
  0x3d   :  { %s1676_s26 = scalar_lea.vmem %s88_s10, 32768  ;;  %p1681_p12 = scmp.lt.s32.totalorder %s88_s10, %s88_s10 }
  0x3e   :  { %p1677_p11 = scmp.ne.s32.totalorder %s88_s10, %s1676_s26  ;;  %p1682_p13 = scmp.lt.s32.totalorder %s1676_s26, %s1676_s26 }
  0x40   :  { %p1683_p0 = por %p1682_p13, %p1681_p12 }
  0x42   :  { %p1684_p1 = pnand %p1683_p0, %p1677_p11 }
  0x44   :  { %1687 = shalt.err (!%p1684_p1)
}
  0x45   :  { %s1706_s2 = smov 256   ;;  %s1707_s27 = smov 16  }
  0x46   :  { %93 = dma.hbm_to_vmem [thread:$0]  %s1901_s6, 32768, %s88_s10, [#allocation14], %s1706_s2, %s1706_s2, %s1707_s27  }
  0x47   :  { %1688 = dma.done.wait [#allocation6], 256  }
  0x48   :  { %1689 = vsyncadd [#allocation6], 4294967040 }
  0x49   :  { %1690 = dma.done.wait [#allocation8], 4352  }
  0x4a   :  { %1691 = vsyncadd [#allocation8], 4294962944 }
  0x4b   :  { %1692 = dma.done.wait [#allocation11], 4224  }
  0x4c   :  { %1693 = vsyncadd [#allocation11], 4294963072 }
  0x4d   :  { %1694 = dma.done.wait [#allocation14], 32768  }
  0x4e   :  { %1695 = vsyncadd [#allocation14], 4294934528  ;;  %vm124_vm0 = vcmask 254976   ;;  %v1708_v1 = vmov 0.0   ;;  %v238_v2 = vld [vmem:[#allocation10 + $0xc8] sm:$0xff]  ;;  %v240_v3 = vld [vmem:[#allocation10 + $0xd8] sm:$0xff] }
  0x4f   :  { %312 = vmatprep.mubr.f32.mxu0 %v1708_v1  ;;  %383 = vmatprep.mubr.f32.mxu1 %v1708_v1  ;;  %126 = vst.msk [vmem:[#allocation3] sm:$0x3] %vm124_vm0, %v1708_v1  ;;  %125 = vst.msk [vmem:[#allocation2] sm:$0x3] %vm124_vm0, %v1708_v1  ;;  %v237_v4 = vld [vmem:[#allocation10 + $0xc0] sm:$0xff]  ;;  %v239_v5 = vld [vmem:[#allocation10 + $0xd0] sm:$0xff] }
  0x50   :  { %272 = vmatprep.subr.mxu0 %v238_v2  ;;  %343 = vmatprep.subr.mxu1 %v240_v3  ;;  %v230_v6 = vld [vmem:[#allocation10 + $0x88] sm:$0xff]  ;;  %v232_v7 = vld [vmem:[#allocation10 + $0x98] sm:$0xff]  ;;  %v229_v8 = vld [vmem:[#allocation10 + $0x80] sm:$0xff]  ;;  %vm132_vm1 = vcmask 261120   ;;  %vm149_vm2 = vcmask 1041409   ;;  %vm1511_vm3 = vcmask 1041408  }
  0x51   :  { %273 = vmatpush1.msra.mxu0 %v237_v4  ;;  %344 = vmatpush1.msra.mxu1 %v239_v5  ;;  %v231_v9 = vld [vmem:[#allocation10 + $0x90] sm:$0xff]  ;;  %v222_v10 = vld [vmem:[#allocation10 + $0x48] sm:$0xff]  ;;  %v224_v11 = vld [vmem:[#allocation10 + $0x58] sm:$0xff]  ;;  %vm1531_vm4 = vcmask 1024  }
  0x52   :  { %274 = vmatprep.subr.mxu0 %v230_v6  ;;  %345 = vmatprep.subr.mxu1 %v232_v7  ;;  %v221_v12 = vld [vmem:[#allocation10 + $0x40] sm:$0xff]  ;;  %v223_v13 = vld [vmem:[#allocation10 + $0x50] sm:$0xff]  ;;  %v214_v14 = vld [vmem:[#allocation10 + $0x8] sm:$0xff] }
  0x53   :  { %275 = vmatpush1.msra.mxu0 %v229_v8  ;;  %346 = vmatpush1.msra.mxu1 %v231_v9  ;;  %v216_v15 = vld [vmem:[#allocation10 + $0x18] sm:$0xff]  ;;  %v213_v16 = vld [vmem:[#allocation10] sm:$0xff]  ;;  %v215_v17 = vld [vmem:[#allocation10 + $0x10] sm:$0xff] }
  0x54   :  { %276 = vmatprep.subr.mxu0 %v222_v10  ;;  %347 = vmatprep.subr.mxu1 %v224_v11  ;;  %v242_v18 = vld [vmem:[#allocation10 + $0xe8] sm:$0xff]  ;;  %v244_v19 = vld [vmem:[#allocation10 + $0xf8] sm:$0xff]  ;;  %v129_v20 = vld [vmem:[#allocation7] sm:$0xff] }
  0x55   :  { %277 = vmatpush1.msra.mxu0 %v221_v12  ;;  %348 = vmatpush1.msra.mxu1 %v223_v13  ;;  %v130_v21 = vld [vmem:[#allocation7 + $0x8] sm:$0xff]  ;;  %v156_v22 = vsel %vm132_vm1, %v129_v20, 0.0  ;;  %v127_v34 = vld [vmem:[#allocation5] sm:$0xff]  ;;  %v128_v35 = vld [vmem:[#allocation5 + $0x8] sm:$0xff] }
  0x56   :  { %278 = vmatprep.subr.mxu0 %v214_v14  ;;  %349 = vmatprep.subr.mxu1 %v216_v15  ;;  %v163_v23 = vsel %vm132_vm1, %v130_v21, 0.0  ;;  %v157_v24 = vrot.slane %v156_v22, 4  ;;  %v155_v36 = vld [vmem:[#allocation3] sm:$0x3]  ;;  %v133_v39 = vsel %vm132_vm1, %v127_v34, 0.0  ;;  %v140_v40 = vsel %vm132_vm1, %v128_v35, 0.0 }
  0x57   :  { %279 = vmatpush1.msra.mxu0 %v213_v16  ;;  %350 = vmatpush1.msra.mxu1 %v215_v17  ;;  %v164_v25 = vrot.slane %v163_v23, 4  ;;  %v134_v41 = vrot.slane %v133_v39, 4  ;;  %v141_v42 = vrot.slane %v140_v40, 4  ;;  %v241_v53 = vld [vmem:[#allocation10 + $0xe0] sm:$0xff]  ;;  %v243_v54 = vld [vmem:[#allocation10 + $0xf0] sm:$0xff]  ;;  %v234_v59 = vld [vmem:[#allocation10 + $0xa8] sm:$0xff] }
  0x58   :  { %414 = vmatprep.subr.mxu0 %v242_v18  ;;  %485 = vmatprep.subr.mxu1 %v244_v19  ;;  %v158_v26 = vadd.f32 %v157_v24, %v156_v22  ;;  %v131_v55 = vld [vmem:[#allocation2] sm:$0x3]  ;;  %v233_v61 = vld [vmem:[#allocation10 + $0xa0] sm:$0xff]  ;;  %v235_v62 = vld [vmem:[#allocation10 + $0xb0] sm:$0xff] }
  0x59   :  { %v165_v27 = vadd.f32 %v164_v25, %v163_v23  ;;  %v135_v45 = vadd.f32 %v134_v41, %v133_v39  ;;  %v142_v46 = vadd.f32 %v141_v42, %v140_v40  ;;  %v236_v60 = vld [vmem:[#allocation10 + $0xb8] sm:$0xff]  ;;  %v226_v0 = vld [vmem:[#allocation10 + $0x68] sm:$0xff]  ;;  %v225_v4 = vld [vmem:[#allocation10 + $0x60] sm:$0xff] }
  0x5a   :  { %v159_v28 = vrot.slane %v158_v26, 2  ;;  %v228_v2 = vld [vmem:[#allocation10 + $0x78] sm:$0xff]  ;;  %v227_v5 = vld [vmem:[#allocation10 + $0x70] sm:$0xff]  ;;  %v218_v6 = vld [vmem:[#allocation10 + $0x28] sm:$0xff] }
  0x5b   :  { %v166_v29 = vrot.slane %v165_v27, 2  ;;  %v136_v47 = vrot.slane %v135_v45, 2  ;;  %v143_v48 = vrot.slane %v142_v46, 2  ;;  %v220_v7 = vld [vmem:[#allocation10 + $0x38] sm:$0xff]  ;;  %v217_v8 = vld [vmem:[#allocation10 + $0x20] sm:$0xff]  ;;  %v219_v9 = vld [vmem:[#allocation10 + $0x30] sm:$0xff] }
  0x5c   :  { %v160_v30 = vadd.f32 %v159_v28, %v158_v26  ;;  %v206_v10 = vld [vmem:[#allocation9 + $0xc8] sm:$0xff]  ;;  %v208_v11 = vld [vmem:[#allocation9 + $0xd8] sm:$0xff]  ;;  %v205_v12 = vld [vmem:[#allocation9 + $0xc0] sm:$0xff] }
  0x5d   :  { %v167_v31 = vadd.f32 %v166_v29, %v165_v27  ;;  %v137_v49 = vadd.f32 %v136_v47, %v135_v45  ;;  %v144_v50 = vadd.f32 %v143_v48, %v142_v46  ;;  %v207_v13 = vld [vmem:[#allocation9 + $0xd0] sm:$0xff]  ;;  %v198_v14 = vld [vmem:[#allocation9 + $0x88] sm:$0xff]  ;;  %v200_v15 = vld [vmem:[#allocation9 + $0x98] sm:$0xff] }
  0x5e   :  { %v161_v32 = vrot.slane %v160_v30, 1  ;;  %v197_v16 = vld [vmem:[#allocation9 + $0x80] sm:$0xff]  ;;  %v199_v17 = vld [vmem:[#allocation9 + $0x90] sm:$0xff]  ;;  %v190_v18 = vld [vmem:[#allocation9 + $0x48] sm:$0xff] }
  0x5f   :  { %v168_v33 = vrot.slane %v167_v31, 1  ;;  %v138_v51 = vrot.slane %v137_v49, 1  ;;  %v145_v52 = vrot.slane %v144_v50, 1  ;;  %v192_v19 = vld [vmem:[#allocation9 + $0x58] sm:$0xff]  ;;  %v189_v20 = vld [vmem:[#allocation9 + $0x40] sm:$0xff]  ;;  %v191_v21 = vld [vmem:[#allocation9 + $0x50] sm:$0xff] }
  0x60   :  { %v162_v37 = vadd.f32 %v161_v32, %v160_v30  ;;  %v182_v22 = vld [vmem:[#allocation9 + $0x8] sm:$0xff]  ;;  %v184_v23 = vld [vmem:[#allocation9 + $0x18] sm:$0xff]  ;;  %v181_v24 = vld [vmem:[#allocation9] sm:$0xff] }
  0x61   :  { %v169_v38 = vadd.f32 %v168_v33, %v167_v31  ;;  %v139_v56 = vadd.f32 %v138_v51, %v137_v49  ;;  %v146_v57 = vadd.f32 %v145_v52, %v144_v50  ;;  %v183_v25 = vld [vmem:[#allocation9 + $0x10] sm:$0xff]  ;;  %v210_v27 = vld [vmem:[#allocation9 + $0xe8] sm:$0xff]  ;;  %v212_v28 = vld [vmem:[#allocation9 + $0xf8] sm:$0xff] }
  0x62   :  { %v209_v29 = vld [vmem:[#allocation9 + $0xe0] sm:$0xff]  ;;  %v211_v30 = vld [vmem:[#allocation9 + $0xf0] sm:$0xff]  ;;  %v202_v31 = vld [vmem:[#allocation9 + $0xa8] sm:$0xff] }
  0x63   :  { %v172_v43 = vsel %vm149_vm2, %v169_v38, %v162_v37  ;;  %v150_v63 = vsel %vm149_vm2, %v146_v57, %v139_v56  ;;  %v204_v32 = vld [vmem:[#allocation9 + $0xb8] sm:$0xff]  ;;  %v201_v33 = vld [vmem:[#allocation9 + $0xa0] sm:$0xff]  ;;  %v203_v34 = vld [vmem:[#allocation9 + $0xb0] sm:$0xff] }
  0x64   :  { %v174_v44 = vadd.f32 %v172_v43, %v155_v36  ;;  %v152_v3 = vadd.f32 %v150_v63, %v131_v55  ;;  %v194_v35 = vld [vmem:[#allocation9 + $0x68] sm:$0xff]  ;;  %v196_v36 = vld [vmem:[#allocation9 + $0x78] sm:$0xff]  ;;  %v193_v37 = vld [vmem:[#allocation9 + $0x60] sm:$0xff] }
  0x65   :  { %v195_v38 = vld [vmem:[#allocation9 + $0x70] sm:$0xff]  ;;  %v186_v39 = vld [vmem:[#allocation9 + $0x28] sm:$0xff]  ;;  %v188_v40 = vld [vmem:[#allocation9 + $0x38] sm:$0xff] }
  0x66   :  { %175 = vst.msk [vmem:[#allocation3] sm:$0x3] %vm124_vm0, %v174_v44  ;;  %154 = vst.msk [vmem:[#allocation2] sm:$0x3] %vm124_vm0, %v152_v3  ;;  %v185_v41 = vld [vmem:[#allocation9 + $0x20] sm:$0xff]  ;;  %v187_v42 = vld [vmem:[#allocation9 + $0x30] sm:$0xff] }
  0x67   :  { %v958_v43 = vld [vmem:[#allocation13 + $0xf8] sm:$0xff]  ;;  %v957_v45 = vld [vmem:[#allocation13 + $0xf0] sm:$0xff]  ;;  %v956_v47 = vld [vmem:[#allocation13 + $0xe8] sm:$0xff] }
  0x68   :  { %v1022_v44 = vld [vmem:[#allocation13 + $0x2f8] sm:$0xff]  ;;  %v1021_v46 = vld [vmem:[#allocation13 + $0x2f0] sm:$0xff]  ;;  %v1020_v48 = vld [vmem:[#allocation13 + $0x2e8] sm:$0xff] }
  0x69   :  { %v955_v49 = vld [vmem:[#allocation13 + $0xe0] sm:$0xff]  ;;  %v954_v51 = vld [vmem:[#allocation13 + $0xd8] sm:$0xff]  ;;  %v1016_v55 = vld [vmem:[#allocation13 + $0x2c8] sm:$0xff] }
  0x6a   :  { %v1019_v50 = vld [vmem:[#allocation13 + $0x2e0] sm:$0xff]  ;;  %v1018_v52 = vld [vmem:[#allocation13 + $0x2d8] sm:$0xff]  ;;  %v1012_v63 = vld [vmem:[#allocation13 + $0x2a8] sm:$0xff] }
  0x6b   :  { %v951_v56 = vld [vmem:[#allocation13 + $0xc0] sm:$0xff]  ;;  %v946_v3 = vld [vmem:[#allocation13 + $0x98] sm:$0xff] }
  0x6c   :  { %v1015_v57 = vld [vmem:[#allocation13 + $0x2c0] sm:$0xff] }
  0x6d   :  { %v180_v58 = vld [vmem:[#allocation3] sm:$0x3]  ;;  %v179_v26 = vld [vmem:[#allocation2] sm:$0x3] }
  0x6e   :  { %1541 = vmatmul.mubr.msk.f32.vlgmr.msra.gmra.mxu0 %vm132_vm1, %v180_v58  ;;  %1542 = vmatmul.mubr.msk.f32.vlgmr.msra.gmra.mxu1 %vm132_vm1, %v180_v58 }
  0x6f   :  { %415 = vmatpush1.msra.mxu0 %v241_v53  ;;  %486 = vmatpush1.msra.mxu1 %v243_v54  ;;  %v953_v53 = vld [vmem:[#allocation13 + $0xd0] sm:$0xff]  ;;  %v952_v54 = vld [vmem:[#allocation13 + $0xc8] sm:$0xff] }
  0x70   :  { %416 = vmatprep.subr.mxu0 %v234_v59  ;;  %487 = vmatprep.subr.mxu1 %v236_v60  ;;  %v1014_v59 = vld [vmem:[#allocation13 + $0x2b8] sm:$0xff]  ;;  %v949_v60 = vld [vmem:[#allocation13 + $0xb0] sm:$0xff] }
  0x71   :  { %417 = vmatpush1.msra.mxu0 %v233_v61  ;;  %488 = vmatpush1.msra.mxu1 %v235_v62  ;;  %v1013_v61 = vld [vmem:[#allocation13 + $0x2b0] sm:$0xff]  ;;  %v948_v62 = vld [vmem:[#allocation13 + $0xa8] sm:$0xff] }
  0x72   :  { %418 = vmatprep.subr.mxu0 %v226_v0  ;;  %489 = vmatprep.subr.mxu1 %v228_v2  ;;  %v947_v0 = vld [vmem:[#allocation13 + $0xa0] sm:$0xff] }
  0x73   :  { %419 = vmatpush1.msra.mxu0 %v225_v4  ;;  %490 = vmatpush1.msra.mxu1 %v227_v5  ;;  %v1011_v2 = vld [vmem:[#allocation13 + $0x2a0] sm:$0xff]  ;;  %v1010_v4 = vld [vmem:[#allocation13 + $0x298] sm:$0xff]  ;;  %v945_v5 = vld [vmem:[#allocation13 + $0x90] sm:$0xff] }
  0x74   :  { %420 = vmatprep.subr.mxu0 %v218_v6  ;;  %491 = vmatprep.subr.mxu1 %v220_v7  ;;  %v1009_v6 = vld [vmem:[#allocation13 + $0x290] sm:$0xff]  ;;  %v944_v7 = vld [vmem:[#allocation13 + $0x88] sm:$0xff] }
  0x75   :  { %421 = vmatpush1.msra.mxu0 %v217_v8  ;;  %454 = vmatprep.mubr.f32.mxu0 %v1708_v1  ;;  %v1008_v8 = vld [vmem:[#allocation13 + $0x288] sm:$0xff] }
  0x76   :  { %492 = vmatpush1.msra.mxu1 %v219_v9  ;;  %1543 = vmatmul.mubr.msk.f32.vlgmr.msra.gmra.mxu0 %vm132_vm1, %v180_v58  ;;  %v943_v9 = vld [vmem:[#allocation13 + $0x80] sm:$0xff] }
  0x77   :  { %525 = vmatprep.mubr.f32.mxu1 %v1708_v1  ;;  %559 = vmatprep.subr.mxu0 %v206_v10  ;;  %v1007_v10 = vld [vmem:[#allocation13 + $0x280] sm:$0xff] }
  0x78   :  { %630 = vmatprep.subr.mxu1 %v208_v11  ;;  %1544 = vmatmul.mubr.msk.f32.vlgmr.msra.gmra.mxu1 %vm132_vm1, %v180_v58  ;;  %v950_v58 = vld [vmem:[#allocation13 + $0xb8] sm:$0xff] }
  0x79   :  { %560 = vmatpush1.msra.mxu0 %v205_v12  ;;  %631 = vmatpush1.msra.mxu1 %v207_v13  ;;  %v942_v11 = vld [vmem:[#allocation13 + $0x78] sm:$0xff]  ;;  %v941_v13 = vld [vmem:[#allocation13 + $0x70] sm:$0xff] }
  0x7a   :  { %561 = vmatprep.subr.mxu0 %v198_v14  ;;  %632 = vmatprep.subr.mxu1 %v200_v15  ;;  %v1006_v12 = vld [vmem:[#allocation13 + $0x278] sm:$0xff]  ;;  %v1005_v14 = vld [vmem:[#allocation13 + $0x270] sm:$0xff]  ;;  %v940_v15 = vld [vmem:[#allocation13 + $0x68] sm:$0xff] }
  0x7b   :  { %562 = vmatpush1.msra.mxu0 %v197_v16  ;;  %633 = vmatpush1.msra.mxu1 %v199_v17  ;;  %v1004_v16 = vld [vmem:[#allocation13 + $0x268] sm:$0xff]  ;;  %v939_v17 = vld [vmem:[#allocation13 + $0x60] sm:$0xff] }
  0x7c   :  { %563 = vmatprep.subr.mxu0 %v190_v18  ;;  %634 = vmatprep.subr.mxu1 %v192_v19  ;;  %v1003_v18 = vld [vmem:[#allocation13 + $0x260] sm:$0xff]  ;;  %v938_v19 = vld [vmem:[#allocation13 + $0x58] sm:$0xff] }
  0x7d   :  { %564 = vmatpush1.msra.mxu0 %v189_v20  ;;  %635 = vmatpush1.msra.mxu1 %v191_v21  ;;  %v1002_v20 = vld [vmem:[#allocation13 + $0x258] sm:$0xff]  ;;  %v937_v21 = vld [vmem:[#allocation13 + $0x50] sm:$0xff] }
  0x7e   :  { %565 = vmatprep.subr.mxu0 %v182_v22  ;;  %636 = vmatprep.subr.mxu1 %v184_v23  ;;  %v1001_v22 = vld [vmem:[#allocation13 + $0x250] sm:$0xff]  ;;  %v936_v23 = vld [vmem:[#allocation13 + $0x48] sm:$0xff] }
  0x7f   :  { %566 = vmatpush1.msra.mxu0 %v181_v24  ;;  %599 = vmatprep.mubr.f32.mxu0 %v1708_v1  ;;  %v1000_v24 = vld [vmem:[#allocation13 + $0x248] sm:$0xff] }
  0x80   :  { %637 = vmatpush1.msra.mxu1 %v183_v25  ;;  %670 = vmatprep.mubr.f32.mxu1 %v1708_v1  ;;  %v935_v25 = vld [vmem:[#allocation13 + $0x40] sm:$0xff] }
  0x81   :  { %1545 = vmatmul.mubr.msk.f32.vlgmr.msra.gmra.mxu0 %vm132_vm1, %v179_v26  ;;  %1546 = vmatmul.mubr.msk.f32.vlgmr.msra.gmra.mxu1 %vm132_vm1, %v179_v26 }
  0x82   :  { %701 = vmatprep.subr.mxu0 %v210_v27  ;;  %772 = vmatprep.subr.mxu1 %v212_v28  ;;  %v934_v27 = vld [vmem:[#allocation13 + $0x38] sm:$0xff] }
  0x83   :  { %702 = vmatpush1.msra.mxu0 %v209_v29  ;;  %773 = vmatpush1.msra.mxu1 %v211_v30  ;;  %v998_v28 = vld [vmem:[#allocation13 + $0x238] sm:$0xff]  ;;  %v933_v29 = vld [vmem:[#allocation13 + $0x30] sm:$0xff] }
  0x84   :  { %703 = vmatprep.subr.mxu0 %v202_v31  ;;  %774 = vmatprep.subr.mxu1 %v204_v32  ;;  %v997_v30 = vld [vmem:[#allocation13 + $0x230] sm:$0xff]  ;;  %v932_v31 = vld [vmem:[#allocation13 + $0x28] sm:$0xff] }
  0x85   :  { %704 = vmatpush1.msra.mxu0 %v201_v33  ;;  %775 = vmatpush1.msra.mxu1 %v203_v34  ;;  %v996_v32 = vld [vmem:[#allocation13 + $0x228] sm:$0xff]  ;;  %v931_v33 = vld [vmem:[#allocation13 + $0x20] sm:$0xff] }
  0x86   :  { %705 = vmatprep.subr.mxu0 %v194_v35  ;;  %776 = vmatprep.subr.mxu1 %v196_v36  ;;  %v995_v34 = vld [vmem:[#allocation13 + $0x220] sm:$0xff]  ;;  %v930_v35 = vld [vmem:[#allocation13 + $0x18] sm:$0xff] }
  0x87   :  { %706 = vmatpush1.msra.mxu0 %v193_v37  ;;  %777 = vmatpush1.msra.mxu1 %v195_v38  ;;  %v994_v36 = vld [vmem:[#allocation13 + $0x218] sm:$0xff]  ;;  %v929_v37 = vld [vmem:[#allocation13 + $0x10] sm:$0xff] }
  0x88   :  { %707 = vmatprep.subr.mxu0 %v186_v39  ;;  %778 = vmatprep.subr.mxu1 %v188_v40  ;;  %v993_v38 = vld [vmem:[#allocation13 + $0x210] sm:$0xff]  ;;  %v928_v39 = vld [vmem:[#allocation13 + $0x8] sm:$0xff] }
  0x89   :  { %708 = vmatpush1.msra.mxu0 %v185_v41  ;;  %741 = vmatprep.mubr.f32.mxu0 %v1708_v1  ;;  %v992_v40 = vld [vmem:[#allocation13 + $0x208] sm:$0xff]  ;;  %v927_v41 = vld [vmem:[#allocation13] sm:$0xff] }
  0x8a   :  { %779 = vmatpush1.msra.mxu1 %v187_v42  ;;  %812 = vmatprep.mubr.f32.mxu1 %v1708_v1  ;;  %v1017_v1 = vld [vmem:[#allocation13 + $0x2d0] sm:$0xff]  ;;  %v991_v42 = vld [vmem:[#allocation13 + $0x200] sm:$0xff] }
  0x8b   :  { %1547 = vmatmul.mubr.msk.f32.vlgmr.msra.gmra.mxu0 %vm132_vm1, %v179_v26  ;;  %1548 = vmatmul.mubr.msk.f32.vlgmr.msra.gmra.mxu1 %vm132_vm1, %v179_v26  ;;  %v999_v26 = vld [vmem:[#allocation13 + $0x240] sm:$0xff] }
  0x8c   :  { %1183 = vmatprep.subr.mxu0 %v958_v43  ;;  %1254 = vmatprep.subr.mxu1 %v1022_v44  ;;  %v990_v43 = vld [vmem:[#allocation13 + $0x1f8] sm:$0xff] }
  0x8d   :  { %1184 = vmatpush1.msra.mxu0 %v957_v45  ;;  %1255 = vmatpush1.msra.mxu1 %v1021_v46  ;;  %v1054_v44 = vld [vmem:[#allocation13 + $0x3f8] sm:$0xff]  ;;  %v989_v45 = vld [vmem:[#allocation13 + $0x1f0] sm:$0xff] }
  0x8e   :  { %1185 = vmatprep.subr.mxu0 %v956_v47  ;;  %1256 = vmatprep.subr.mxu1 %v1020_v48  ;;  %v1053_v46 = vld [vmem:[#allocation13 + $0x3f0] sm:$0xff]  ;;  %v988_v47 = vld [vmem:[#allocation13 + $0x1e8] sm:$0xff] }
  0x8f   :  { %1186 = vmatpush1.msra.mxu0 %v955_v49  ;;  %1257 = vmatpush1.msra.mxu1 %v1019_v50  ;;  %v1052_v48 = vld [vmem:[#allocation13 + $0x3e8] sm:$0xff]  ;;  %v987_v49 = vld [vmem:[#allocation13 + $0x1e0] sm:$0xff] }
  0x90   :  { %1187 = vmatprep.subr.mxu0 %v954_v51  ;;  %1258 = vmatprep.subr.mxu1 %v1018_v52  ;;  %v1051_v50 = vld [vmem:[#allocation13 + $0x3e0] sm:$0xff]  ;;  %v986_v51 = vld [vmem:[#allocation13 + $0x1d8] sm:$0xff] }
  0x91   :  { %1188 = vmatpush1.msra.mxu0 %v953_v53  ;;  %1259 = vmatpush1.msra.mxu1 %v1017_v1  ;;  %v1050_v52 = vld [vmem:[#allocation13 + $0x3d8] sm:$0xff]  ;;  %v985_v53 = vld [vmem:[#allocation13 + $0x1d0] sm:$0xff] }
  0x92   :  { %1189 = vmatprep.subr.mxu0 %v952_v54  ;;  %1260 = vmatprep.subr.mxu1 %v1016_v55  ;;  %v1049_v1 = vld [vmem:[#allocation13 + $0x3d0] sm:$0xff]  ;;  %v984_v54 = vld [vmem:[#allocation13 + $0x1c8] sm:$0xff] }
  0x93   :  { %1190 = vmatpush1.msra.mxu0 %v951_v56  ;;  %1261 = vmatpush1.msra.mxu1 %v1015_v57  ;;  %v1048_v55 = vld [vmem:[#allocation13 + $0x3c8] sm:$0xff]  ;;  %v983_v56 = vld [vmem:[#allocation13 + $0x1c0] sm:$0xff] }
  0x94   :  { %1191 = vmatprep.subr.mxu0 %v950_v58  ;;  %1262 = vmatprep.subr.mxu1 %v1014_v59  ;;  %v1047_v57 = vld [vmem:[#allocation13 + $0x3c0] sm:$0xff]  ;;  %v982_v58 = vld [vmem:[#allocation13 + $0x1b8] sm:$0xff] }
  0x95   :  { %1192 = vmatpush1.msra.mxu0 %v949_v60  ;;  %1263 = vmatpush1.msra.mxu1 %v1013_v61  ;;  %v1046_v59 = vld [vmem:[#allocation13 + $0x3b8] sm:$0xff]  ;;  %v981_v60 = vld [vmem:[#allocation13 + $0x1b0] sm:$0xff] }
  0x96   :  { %1193 = vmatprep.subr.mxu0 %v948_v62  ;;  %1264 = vmatprep.subr.mxu1 %v1012_v63  ;;  %v1045_v61 = vld [vmem:[#allocation13 + $0x3b0] sm:$0xff]  ;;  %v980_v62 = vld [vmem:[#allocation13 + $0x1a8] sm:$0xff] }
  0x97   :  { %1194 = vmatpush1.msra.mxu0 %v947_v0  ;;  %1265 = vmatpush1.msra.mxu1 %v1011_v2  ;;  %v1044_v63 = vld [vmem:[#allocation13 + $0x3a8] sm:$0xff]  ;;  %v979_v0 = vld [vmem:[#allocation13 + $0x1a0] sm:$0xff] }
  0x98   :  { %1195 = vmatprep.subr.mxu0 %v946_v3  ;;  %1266 = vmatprep.subr.mxu1 %v1010_v4  ;;  %v1043_v2 = vld [vmem:[#allocation13 + $0x3a0] sm:$0xff]  ;;  %v978_v3 = vld [vmem:[#allocation13 + $0x198] sm:$0xff] }
  0x99   :  { %1196 = vmatpush1.msra.mxu0 %v945_v5  ;;  %1267 = vmatpush1.msra.mxu1 %v1009_v6  ;;  %v1042_v4 = vld [vmem:[#allocation13 + $0x398] sm:$0xff]  ;;  %v977_v5 = vld [vmem:[#allocation13 + $0x190] sm:$0xff] }
  0x9a   :  { %1197 = vmatprep.subr.mxu0 %v944_v7  ;;  %1268 = vmatprep.subr.mxu1 %v1008_v8  ;;  %v1041_v6 = vld [vmem:[#allocation13 + $0x390] sm:$0xff]  ;;  %v976_v7 = vld [vmem:[#allocation13 + $0x188] sm:$0xff] }
  0x9b   :  { %1198 = vmatpush1.msra.mxu0 %v943_v9  ;;  %1269 = vmatpush1.msra.mxu1 %v1007_v10  ;;  %v1040_v8 = vld [vmem:[#allocation13 + $0x388] sm:$0xff]  ;;  %v975_v9 = vld [vmem:[#allocation13 + $0x180] sm:$0xff] }
  0x9c   :  { %1199 = vmatprep.subr.mxu0 %v942_v11  ;;  %1270 = vmatprep.subr.mxu1 %v1006_v12  ;;  %v1039_v10 = vld [vmem:[#allocation13 + $0x380] sm:$0xff]  ;;  %v974_v11 = vld [vmem:[#allocation13 + $0x178] sm:$0xff] }
  0x9d   :  { %1200 = vmatpush1.msra.mxu0 %v941_v13  ;;  %1271 = vmatpush1.msra.mxu1 %v1005_v14  ;;  %v1038_v12 = vld [vmem:[#allocation13 + $0x378] sm:$0xff]  ;;  %v973_v13 = vld [vmem:[#allocation13 + $0x170] sm:$0xff] }
  0x9e   :  { %1201 = vmatprep.subr.mxu0 %v940_v15  ;;  %1272 = vmatprep.subr.mxu1 %v1004_v16  ;;  %v1037_v14 = vld [vmem:[#allocation13 + $0x370] sm:$0xff]  ;;  %v972_v15 = vld [vmem:[#allocation13 + $0x168] sm:$0xff] }
  0x9f   :  { %1202 = vmatpush1.msra.mxu0 %v939_v17  ;;  %1273 = vmatpush1.msra.mxu1 %v1003_v18  ;;  %v1036_v16 = vld [vmem:[#allocation13 + $0x368] sm:$0xff]  ;;  %v971_v17 = vld [vmem:[#allocation13 + $0x160] sm:$0xff] }
  0xa0   :  { %1203 = vmatprep.subr.mxu0 %v938_v19  ;;  %1274 = vmatprep.subr.mxu1 %v1002_v20  ;;  %v1035_v18 = vld [vmem:[#allocation13 + $0x360] sm:$0xff]  ;;  %v970_v19 = vld [vmem:[#allocation13 + $0x158] sm:$0xff] }
  0xa1   :  { %1204 = vmatpush1.msra.mxu0 %v937_v21  ;;  %1275 = vmatpush1.msra.mxu1 %v1001_v22  ;;  %v1034_v20 = vld [vmem:[#allocation13 + $0x358] sm:$0xff]  ;;  %v969_v21 = vld [vmem:[#allocation13 + $0x150] sm:$0xff] }
  0xa2   :  { %1205 = vmatprep.subr.mxu0 %v936_v23  ;;  %1276 = vmatprep.subr.mxu1 %v1000_v24  ;;  %v1033_v22 = vld [vmem:[#allocation13 + $0x350] sm:$0xff]  ;;  %v968_v23 = vld [vmem:[#allocation13 + $0x148] sm:$0xff] }
  0xa3   :  { %1206 = vmatpush1.msra.mxu0 %v935_v25  ;;  %1277 = vmatpush1.msra.mxu1 %v999_v26  ;;  %v1032_v24 = vld [vmem:[#allocation13 + $0x348] sm:$0xff]  ;;  %v821_v25 = vlaneseq  ;;  %v967_v26 = vld [vmem:[#allocation13 + $0x140] sm:$0xff] }
  0xa4   :  { %1207 = vmatprep.subr.mxu0 %v934_v27  ;;  %1278 = vmatprep.subr.mxu1 %v998_v28  ;;  %v1031_v27 = vld [vmem:[#allocation13 + $0x340] sm:$0xff]  ;;  %v966_v28 = vld [vmem:[#allocation13 + $0x138] sm:$0xff] }
  0xa5   :  { %1208 = vmatpush1.msra.mxu0 %v933_v29  ;;  %1279 = vmatpush1.msra.mxu1 %v997_v30  ;;  %v1030_v29 = vld [vmem:[#allocation13 + $0x338] sm:$0xff]  ;;  %v965_v30 = vld [vmem:[#allocation13 + $0x130] sm:$0xff] }
  0xa6   :  { %1209 = vmatprep.subr.mxu0 %v932_v31  ;;  %1280 = vmatprep.subr.mxu1 %v996_v32  ;;  %v1029_v31 = vld [vmem:[#allocation13 + $0x330] sm:$0xff]  ;;  %v964_v32 = vld [vmem:[#allocation13 + $0x128] sm:$0xff] }
  0xa7   :  { %1210 = vmatpush1.msra.mxu0 %v931_v33  ;;  %1281 = vmatpush1.msra.mxu1 %v995_v34  ;;  %v1028_v33 = vld [vmem:[#allocation13 + $0x328] sm:$0xff]  ;;  %v1818_v34 = vshrl.u32 %v821_v25, 7 }
  0xa8   :  { %1211 = vmatprep.subr.mxu0 %v930_v35  ;;  %1282 = vmatprep.subr.mxu1 %v994_v36  ;;  %v963_v35 = vld [vmem:[#allocation13 + $0x120] sm:$0xff] }
  0xa9   :  { %1212 = vmatpush1.msra.mxu0 %v929_v37  ;;  %1283 = vmatpush1.msra.mxu1 %v993_v38  ;;  %v1027_v36 = vld [vmem:[#allocation13 + $0x320] sm:$0xff]  ;;  %v962_v37 = vld [vmem:[#allocation13 + $0x118] sm:$0xff]  ;;  %v843_v25 = vsub.s32 5, %v1818_v34 }
  0xaa   :  { %1213 = vmatprep.subr.mxu0 %v928_v39  ;;  %1284 = vmatprep.subr.mxu1 %v992_v40  ;;  %v1026_v38 = vld [vmem:[#allocation13 + $0x318] sm:$0xff]  ;;  %v839_v39 = vsub.s32 4, %v1818_v34  ;;  %v847_v40 = vsub.s32 6, %v1818_v34 }
  0xab   :  { %1214 = vmatpush1.msra.mxu0 %v927_v41  ;;  %1285 = vmatpush1.msra.mxu1 %v991_v42  ;;  %v961_v41 = vld [vmem:[#allocation13 + $0x110] sm:$0xff] }
  0xac   :  { %1215 = vmatprep.subr.mxu0 %v990_v43  ;;  %1286 = vmatprep.subr.mxu1 %v1054_v44  ;;  %v1025_v42 = vld [vmem:[#allocation13 + $0x310] sm:$0xff]  ;;  %v960_v44 = vld [vmem:[#allocation13 + $0x108] sm:$0xff] }
  0xad   :  { %1216 = vmatpush2.msra.mxu0 %v989_v45  ;;  %1287 = vmatpush2.msra.mxu1 %v1053_v46  ;;  %v1825_v43 = vld [vmem:[%s1899_s4] sm:$0xff]  ;;  %v1024_v45 = vld [vmem:[#allocation13 + $0x308] sm:$0xff] }
  0xae   :  { %1217 = vmatprep.subr.mxu0 %v988_v47  ;;  %1288 = vmatprep.subr.mxu1 %v1052_v48  ;;  %v1828_v46 = vrot.slane %v1825_v43, %v839_v39  ;;  %v1831_v47 = vrot.slane %v1825_v43, %v847_v40  ;;  %v959_v48 = vld [vmem:[#allocation13 + $0x100] sm:$0xff] }
  0xaf   :  { %1218 = vmatpush2.msra.mxu0 %v987_v49  ;;  %1289 = vmatpush2.msra.mxu1 %v1051_v50  ;;  %v1023_v49 = vld [vmem:[#allocation13 + $0x300] sm:$0xff]  ;;  %v1833_v50 = vld [vmem:[#allocation12] sm:$0xff] }
  0xb0   :  { %1219 = vmatprep.subr.mxu0 %v986_v51  ;;  %1290 = vmatprep.subr.mxu1 %v1050_v52  ;;  %v1086_v51 = vld [vmem:[#allocation13 + $0x4f8] sm:$0xff] }
  0xb1   :  { %1220 = vmatpush2.msra.mxu0 %v985_v53  ;;  %1291 = vmatpush2.msra.mxu1 %v1049_v1  ;;  %v1150_v52 = vld [vmem:[#allocation13 + $0x6f8] sm:$0xff]  ;;  %v1836_v53 = vrot.slane %v1833_v50, %v839_v39  ;;  %v1839_v1 = vrot.slane %v1833_v50, %v847_v40 }
  0xb2   :  { %1221 = vmatprep.subr.mxu0 %v984_v54  ;;  %1292 = vmatprep.subr.mxu1 %v1048_v55 }
  0xb3   :  { %1222 = vmatpush2.msra.mxu0 %v983_v56  ;;  %1293 = vmatpush2.msra.mxu1 %v1047_v57 }
  0xb4   :  { %1223 = vmatprep.subr.mxu0 %v982_v58  ;;  %1294 = vmatprep.subr.mxu1 %v1046_v59 }
  0xb5   :  { %1224 = vmatpush2.msra.mxu0 %v981_v60  ;;  %1295 = vmatpush2.msra.mxu1 %v1045_v61  ;;  %v1842_v60 = vsub.s32 0, %v1818_v34  ;;  %v831_v61 = vsub.s32 2, %v1818_v34 }
  0xb6   :  { %1225 = vmatprep.subr.mxu0 %v980_v62  ;;  %1296 = vmatprep.subr.mxu1 %v1044_v63  ;;  %v1846_v62 = vsub.s32 1, %v1818_v34  ;;  %v835_v63 = vsub.s32 3, %v1818_v34 }
  0xb7   :  { %1226 = vmatpush2.msra.mxu0 %v979_v0  ;;  %1297 = vmatpush2.msra.mxu1 %v1043_v2 }
  0xb8   :  { %1227 = vmatprep.subr.mxu0 %v978_v3  ;;  %1298 = vmatprep.subr.mxu1 %v1042_v4  ;;  %v824_v3 = vrot.slane %v1825_v43, %v1842_v60  ;;  %v832_v4 = vrot.slane %v1825_v43, %v831_v61 }
  0xb9   :  { %1228 = vmatpush2.msra.mxu0 %v977_v5  ;;  %1299 = vmatpush2.msra.mxu1 %v1041_v6 }
  0xba   :  { %1229 = vmatprep.subr.mxu0 %v976_v7  ;;  %1300 = vmatprep.subr.mxu1 %v1040_v8 }
  0xbb   :  { %1230 = vmatpush2.msra.mxu0 %v975_v9  ;;  %1301 = vmatpush2.msra.mxu1 %v1039_v10  ;;  %v828_v9 = vrot.slane %v1825_v43, %v1846_v62  ;;  %v836_v10 = vrot.slane %v1825_v43, %v835_v63 }
  0xbc   :  { %1231 = vmatprep.subr.mxu0 %v974_v11  ;;  %1302 = vmatprep.subr.mxu1 %v1038_v12  ;;  %v874_v11 = vrot.slane %v1833_v50, %v1842_v60  ;;  %v882_v12 = vrot.slane %v1833_v50, %v831_v61 }
  0xbd   :  { %1232 = vmatpush2.msra.mxu0 %v973_v13  ;;  %1303 = vmatpush2.msra.mxu1 %v1037_v14 }
  0xbe   :  { %1233 = vmatprep.subr.mxu0 %v972_v15  ;;  %1304 = vmatprep.subr.mxu1 %v1036_v16  ;;  %v878_v15 = vrot.slane %v1833_v50, %v1846_v62  ;;  %v886_v16 = vrot.slane %v1833_v50, %v835_v63 }
  0xbf   :  { %1234 = vmatpush2.msra.mxu0 %v971_v17  ;;  %1305 = vmatpush2.msra.mxu1 %v1035_v18 }
  0xc0   :  { %1235 = vmatprep.subr.mxu0 %v970_v19  ;;  %1306 = vmatprep.subr.mxu1 %v1034_v20 }
  0xc1   :  { %1236 = vmatpush2.msra.mxu0 %v969_v21  ;;  %1307 = vmatpush2.msra.mxu1 %v1033_v22 }
  0xc2   :  { %1237 = vmatprep.subr.mxu0 %v968_v23  ;;  %1308 = vmatprep.subr.mxu1 %v1032_v24 }
  0xc3   :  { %1238 = vmatpush2.msra.mxu0 %v967_v26  ;;  %1309 = vmatpush2.msra.mxu1 %v1031_v27  ;;  %v851_v26 = vsub.s32 7, %v1818_v34 }
  0xc4   :  { %1239 = vmatprep.subr.mxu0 %v966_v28  ;;  %1310 = vmatprep.subr.mxu1 %v1030_v29 }
  0xc5   :  { %1240 = vmatpush2.msra.mxu0 %v965_v30  ;;  %1311 = vmatpush2.msra.mxu1 %v1029_v31  ;;  %v852_v40 = vrot.slane %v1825_v43, %v851_v26 }
  0xc6   :  { %1241 = vmatprep.subr.mxu0 %v964_v32  ;;  %1312 = vmatprep.subr.mxu1 %v1028_v33 }
  0xc7   :  { %1242 = vmatpush2.msra.mxu0 %v963_v35  ;;  %1313 = vmatpush2.msra.mxu1 %v1027_v36  ;;  %v844_v36 = vrot.slane %v1825_v43, %v843_v25  ;;  %v1083_v43 = vld [vmem:[#allocation13 + $0x4e0] sm:$0xff] }
  0xc8   :  { %1243 = vmatprep.subr.mxu0 %v962_v37  ;;  %1314 = vmatprep.subr.mxu1 %v1026_v38  ;;  %v1085_v37 = vld [vmem:[#allocation13 + $0x4f0] sm:$0xff] }
  0xc9   :  { %1244 = vmatpush2.msra.mxu0 %v961_v41  ;;  %1315 = vmatpush2.msra.mxu1 %v1025_v42  ;;  %v1149_v41 = vld [vmem:[#allocation13 + $0x6f0] sm:$0xff]  ;;  %v1084_v42 = vld [vmem:[#allocation13 + $0x4e8] sm:$0xff] }
  0xca   :  { %1245 = vmatprep.subr.mxu0 %v960_v44  ;;  %1316 = vmatprep.subr.mxu1 %v1024_v45  ;;  %v1148_v45 = vld [vmem:[#allocation13 + $0x6e8] sm:$0xff] }
  0xcb   :  { %1246 = vmatpush2.msra.mxu0 %v959_v48  ;;  %1317 = vmatpush2.msra.mxu1 %v1023_v49  ;;  %v894_v48 = vrot.slane %v1833_v50, %v843_v25  ;;  %v902_v49 = vrot.slane %v1833_v50, %v851_v26  ;;  %v1069_v25 = vld [vmem:[#allocation13 + $0x470] sm:$0xff] }
  0xcc   :  { %1325 = vmatprep.subr.mxu0 %v1086_v51  ;;  %1396 = vmatprep.subr.mxu1 %v1150_v52  ;;  %v1133_v26 = vld [vmem:[#allocation13 + $0x670] sm:$0xff] }
 0x12e   :  { %v314_v54 = vpop.f32.mrf.mxu0  ;;  %v385_v55 = vpop.f32.mrf.mxu1 }
 0x130   :  { %v316_v56 = vpop.f32.mrf.mxu0  ;;  %v387_v57 = vpop.f32.mrf.mxu1 }
 0x136   :  { %v456_v58 = vpop.f32.mrf.mxu0 }
 0x138   :  { %v527_v59 = vpop.f32.mrf.mxu1  ;;  %v458_v0 = vpop.f32.mrf.mxu0 }
 0x13a   :  { %v529_v2 = vpop.f32.mrf.mxu1 }
 0x141   :  { %v601_v5 = vpop.f32.mrf.mxu0  ;;  %v672_v6 = vpop.f32.mrf.mxu1 }
 0x142   :  { %v602_v7 = vadd.f32 %v601_v5, %v314_v54  ;;  %v673_v8 = vadd.f32 %v672_v6, %v385_v55 }
 0x143   :  { %v603_v13 = vpop.f32.mrf.mxu0  ;;  %v674_v14 = vpop.f32.mrf.mxu1 }
 0x144   :  { %v861_v17 = vmul.f32 %v824_v3, %v602_v7  ;;  %v863_v18 = vmul.f32 %v832_v4, %v673_v8  ;;  %v604_v19 = vadd.f32 %v603_v13, %v316_v56  ;;  %v675_v20 = vadd.f32 %v674_v14, %v387_v57  ;;  %v1147_v56 = vld [vmem:[#allocation13 + $0x6e0] sm:$0xff]  ;;  %v1082_v57 = vld [vmem:[#allocation13 + $0x4d8] sm:$0xff] }
 0x145   :  { %v1079_v3 = vld [vmem:[#allocation13 + $0x4c0] sm:$0xff]  ;;  %v1142_v7 = vld [vmem:[#allocation13 + $0x6b8] sm:$0xff] }
 0x146   :  { %v862_v21 = vmul.f32 %v828_v9, %v604_v19  ;;  %v864_v22 = vmul.f32 %v836_v10, %v675_v20  ;;  %v911_v23 = vadd.f32 %v874_v11, %v861_v17  ;;  %v913_v24 = vadd.f32 %v882_v12, %v863_v18  ;;  %v1143_v4 = vld [vmem:[#allocation13 + $0x6c0] sm:$0xff]  ;;  %v1077_v9 = vld [vmem:[#allocation13 + $0x4b0] sm:$0xff]  ;;  %v1076_v11 = vld [vmem:[#allocation13 + $0x4a8] sm:$0xff] }
 0x147   :  { %v1141_v10 = vld [vmem:[#allocation13 + $0x6b0] sm:$0xff]  ;;  %v1140_v12 = vld [vmem:[#allocation13 + $0x6a8] sm:$0xff]  ;;  %v1075_v13 = vld [vmem:[#allocation13 + $0x4a0] sm:$0xff] }
 0x148   :  { %v912_v27 = vadd.f32 %v878_v15, %v862_v21  ;;  %v914_v28 = vadd.f32 %v886_v16, %v864_v22  ;;  %v919_v31 = vmax.f32 %v911_v23, 0.0  ;;  %v921_v32 = vmax.f32 %v913_v24, 0.0  ;;  %v1139_v14 = vld [vmem:[#allocation13 + $0x6a0] sm:$0xff]  ;;  %v1074_v15 = vld [vmem:[#allocation13 + $0x498] sm:$0xff]  ;;  %v1073_v17 = vld [vmem:[#allocation13 + $0x490] sm:$0xff] }
 0x149   :  { %v1138_v16 = vld [vmem:[#allocation13 + $0x698] sm:$0xff]  ;;  %v1137_v18 = vld [vmem:[#allocation13 + $0x690] sm:$0xff]  ;;  %v1072_v19 = vld [vmem:[#allocation13 + $0x488] sm:$0xff] }
 0x14a   :  { %v920_v29 = vmax.f32 %v912_v27, 0.0  ;;  %v922_v30 = vmax.f32 %v914_v28, 0.0  ;;  %v1136_v20 = vld [vmem:[#allocation13 + $0x688] sm:$0xff]  ;;  %v1071_v21 = vld [vmem:[#allocation13 + $0x480] sm:$0xff]  ;;  %v1070_v23 = vld [vmem:[#allocation13 + $0x478] sm:$0xff] }
 0x14b   :  { %v743_v33 = vpop.f32.mrf.mxu0  ;;  %v814_v35 = vpop.f32.mrf.mxu1  ;;  %v1135_v22 = vld [vmem:[#allocation13 + $0x680] sm:$0xff]  ;;  %v1134_v24 = vld [vmem:[#allocation13 + $0x678] sm:$0xff]  ;;  %v1068_v27 = vld [vmem:[#allocation13 + $0x468] sm:$0xff] }
 0x14c   :  { %v744_v38 = vadd.f32 %v743_v33, %v456_v58  ;;  %v815_v39 = vadd.f32 %v814_v35, %v527_v59  ;;  %1247 = vmatprep.mubr.f32.mxu0 %v920_v29  ;;  %1318 = vmatprep.mubr.f32.mxu1 %v922_v30  ;;  %v1146_v58 = vld [vmem:[#allocation13 + $0x6d8] sm:$0xff]  ;;  %v1132_v28 = vld [vmem:[#allocation13 + $0x668] sm:$0xff]  ;;  %v1067_v29 = vld [vmem:[#allocation13 + $0x460] sm:$0xff] }
 0x14d   :  { %v745_v34 = vpop.f32.mrf.mxu0  ;;  %v816_v44 = vpop.f32.mrf.mxu1  ;;  %1248 = vmatmul.mubr.f32.vlgmr.msra.gmra.mxu0 %v919_v31  ;;  %1319 = vmatmul.mubr.f32.vlgmr.msra.gmra.mxu1 %v921_v32  ;;  %v1131_v30 = vld [vmem:[#allocation13 + $0x660] sm:$0xff]  ;;  %v1066_v31 = vld [vmem:[#allocation13 + $0x458] sm:$0xff]  ;;  %v1065_v33 = vld [vmem:[#allocation13 + $0x450] sm:$0xff] }
 0x14e   :  { %v865_v51 = vmul.f32 %v1828_v46, %v744_v38  ;;  %v867_v52 = vmul.f32 %v1831_v47, %v815_v39  ;;  %v746_v54 = vadd.f32 %v745_v34, %v458_v0  ;;  %v817_v55 = vadd.f32 %v816_v44, %v529_v2  ;;  %1326 = vmatpush1.msra.mxu0 %v1085_v37  ;;  %v1081_v46 = vld [vmem:[#allocation13 + $0x4d0] sm:$0xff]  ;;  %v1080_v0 = vld [vmem:[#allocation13 + $0x4c8] sm:$0xff]  ;;  %v1130_v32 = vld [vmem:[#allocation13 + $0x658] sm:$0xff] }
 0x14f   :  { %1397 = vmatpush1.msra.mxu1 %v1149_v41  ;;  %1327 = vmatprep.subr.mxu0 %v1084_v42  ;;  %v1145_v47 = vld [vmem:[#allocation13 + $0x6d0] sm:$0xff]  ;;  %v1144_v2 = vld [vmem:[#allocation13 + $0x6c8] sm:$0xff]  ;;  %v1063_v38 = vld [vmem:[#allocation13 + $0x440] sm:$0xff] }
 0x150   :  { %v1870_v59 = vadd.f32 %v1836_v53, %v865_v51  ;;  %v1873_v61 = vadd.f32 %v1839_v1, %v867_v52  ;;  %v866_v50 = vmul.f32 %v844_v36, %v746_v54  ;;  %v868_v63 = vmul.f32 %v852_v40, %v817_v55  ;;  %1398 = vmatprep.subr.mxu1 %v1148_v45  ;;  %v1078_v53 = vld [vmem:[#allocation13 + $0x4b8] sm:$0xff]  ;;  %v1129_v35 = vld [vmem:[#allocation13 + $0x650] sm:$0xff]  ;;  %v1064_v36 = vld [vmem:[#allocation13 + $0x448] sm:$0xff] }
 0x151   :  { %1328 = vmatpush1.msra.mxu0 %v1083_v43  ;;  %1399 = vmatpush1.msra.mxu1 %v1147_v56  ;;  %v1128_v37 = vld [vmem:[#allocation13 + $0x648] sm:$0xff]  ;;  %v1127_v39 = vld [vmem:[#allocation13 + $0x640] sm:$0xff]  ;;  %v1062_v40 = vld [vmem:[#allocation13 + $0x438] sm:$0xff] }
 0x152   :  { %1329 = vmatprep.subr.mxu0 %v1082_v57  ;;  %1400 = vmatprep.subr.mxu1 %v1146_v58  ;;  %v916_v5 = vadd.f32 %v894_v48, %v866_v50  ;;  %v918_v6 = vadd.f32 %v902_v49, %v868_v63  ;;  %v1126_v41 = vld [vmem:[#allocation13 + $0x638] sm:$0xff]  ;;  %v1061_v42 = vld [vmem:[#allocation13 + $0x430] sm:$0xff]  ;;  %v1060_v44 = vld [vmem:[#allocation13 + $0x428] sm:$0xff] }
 0x153   :  { %1330 = vmatpush1.msra.mxu0 %v1081_v46  ;;  %1401 = vmatpush1.msra.mxu1 %v1145_v47  ;;  %v1125_v34 = vld [vmem:[#allocation13 + $0x630] sm:$0xff]  ;;  %v1124_v45 = vld [vmem:[#allocation13 + $0x628] sm:$0xff]  ;;  %v1059_v48 = vld [vmem:[#allocation13 + $0x420] sm:$0xff] }
 0x154   :  { %1331 = vmatprep.subr.mxu0 %v1080_v0  ;;  %1402 = vmatprep.subr.mxu1 %v1144_v2  ;;  %v924_v1 = vmax.f32 %v916_v5, 0.0  ;;  %v926_v8 = vmax.f32 %v918_v6, 0.0  ;;  %v1123_v49 = vld [vmem:[#allocation13 + $0x620] sm:$0xff]  ;;  %v1058_v51 = vld [vmem:[#allocation13 + $0x418] sm:$0xff]  ;;  %v1057_v54 = vld [vmem:[#allocation13 + $0x410] sm:$0xff] }
 0x155   :  { %1332 = vmatpush1.msra.mxu0 %v1079_v3  ;;  %1403 = vmatpush1.msra.mxu1 %v1143_v4  ;;  %v1122_v52 = vld [vmem:[#allocation13 + $0x618] sm:$0xff]  ;;  %v1121_v55 = vld [vmem:[#allocation13 + $0x610] sm:$0xff]  ;;  %v1056_v43 = vld [vmem:[#allocation13 + $0x408] sm:$0xff] }
 0x156   :  { %1333 = vmatprep.subr.mxu0 %v1078_v53  ;;  %1389 = vmatprep.mubr.f32.mxu0 %v924_v1  ;;  %v1120_v56 = vld [vmem:[#allocation13 + $0x608] sm:$0xff]  ;;  %v1055_v57 = vld [vmem:[#allocation13 + $0x400] sm:$0xff]  ;;  %v1118_v50 = vld [vmem:[#allocation13 + $0x5f8] sm:$0xff] }
 0x157   :  { %1404 = vmatprep.subr.mxu1 %v1142_v7  ;;  %1460 = vmatprep.mubr.f32.mxu1 %v926_v8  ;;  %v1119_v58 = vld [vmem:[#allocation13 + $0x600] sm:$0xff]  ;;  %v1182_v63 = vld [vmem:[#allocation13 + $0x7f8] sm:$0xff]  ;;  %v1117_v46 = vld [vmem:[#allocation13 + $0x5f0] sm:$0xff] }
 0x158   :  { %1334 = vmatpush1.msra.mxu0 %v1077_v9  ;;  %1405 = vmatpush1.msra.mxu1 %v1141_v10  ;;  %v1181_v47 = vld [vmem:[#allocation13 + $0x7f0] sm:$0xff]  ;;  %v1116_v0 = vld [vmem:[#allocation13 + $0x5e8] sm:$0xff]  ;;  %v1115_v3 = vld [vmem:[#allocation13 + $0x5e0] sm:$0xff] }
 0x159   :  { %1335 = vmatprep.subr.mxu0 %v1076_v11  ;;  %1406 = vmatprep.subr.mxu1 %v1140_v12  ;;  %v1180_v2 = vld [vmem:[#allocation13 + $0x7e8] sm:$0xff]  ;;  %v1179_v4 = vld [vmem:[#allocation13 + $0x7e0] sm:$0xff]  ;;  %v1114_v5 = vld [vmem:[#allocation13 + $0x5d8] sm:$0xff] }
 0x15a   :  { %1336 = vmatpush1.msra.mxu0 %v1075_v13  ;;  %1407 = vmatpush1.msra.mxu1 %v1139_v14  ;;  %v1178_v6 = vld [vmem:[#allocation13 + $0x7d8] sm:$0xff]  ;;  %v1113_v53 = vld [vmem:[#allocation13 + $0x5d0] sm:$0xff]  ;;  %v1112_v7 = vld [vmem:[#allocation13 + $0x5c8] sm:$0xff] }
 0x15b   :  { %1337 = vmatprep.subr.mxu0 %v1074_v15  ;;  %1408 = vmatprep.subr.mxu1 %v1138_v16  ;;  %v1177_v1 = vld [vmem:[#allocation13 + $0x7d0] sm:$0xff]  ;;  %v1176_v8 = vld [vmem:[#allocation13 + $0x7c8] sm:$0xff]  ;;  %v1111_v9 = vld [vmem:[#allocation13 + $0x5c0] sm:$0xff] }
 0x15c   :  { %1338 = vmatpush1.msra.mxu0 %v1073_v17  ;;  %1409 = vmatpush1.msra.mxu1 %v1137_v18  ;;  %v1175_v10 = vld [vmem:[#allocation13 + $0x7c0] sm:$0xff]  ;;  %v1110_v11 = vld [vmem:[#allocation13 + $0x5b8] sm:$0xff]  ;;  %v1109_v13 = vld [vmem:[#allocation13 + $0x5b0] sm:$0xff] }
 0x15d   :  { %1339 = vmatprep.subr.mxu0 %v1072_v19  ;;  %1410 = vmatprep.subr.mxu1 %v1136_v20  ;;  %v1174_v12 = vld [vmem:[#allocation13 + $0x7b8] sm:$0xff]  ;;  %v1173_v14 = vld [vmem:[#allocation13 + $0x7b0] sm:$0xff]  ;;  %v1108_v15 = vld [vmem:[#allocation13 + $0x5a8] sm:$0xff] }
 0x15e   :  { %1340 = vmatpush1.msra.mxu0 %v1071_v21  ;;  %1411 = vmatpush1.msra.mxu1 %v1135_v22  ;;  %v1172_v16 = vld [vmem:[#allocation13 + $0x7a8] sm:$0xff]  ;;  %v1107_v17 = vld [vmem:[#allocation13 + $0x5a0] sm:$0xff]  ;;  %v1106_v19 = vld [vmem:[#allocation13 + $0x598] sm:$0xff] }
 0x15f   :  { %1341 = vmatprep.subr.mxu0 %v1070_v23  ;;  %1412 = vmatprep.subr.mxu1 %v1134_v24  ;;  %v1171_v18 = vld [vmem:[#allocation13 + $0x7a0] sm:$0xff]  ;;  %v1170_v20 = vld [vmem:[#allocation13 + $0x798] sm:$0xff]  ;;  %v1105_v21 = vld [vmem:[#allocation13 + $0x590] sm:$0xff] }
 0x160   :  { %1342 = vmatpush1.msra.mxu0 %v1069_v25  ;;  %1413 = vmatpush1.msra.mxu1 %v1133_v26  ;;  %v1169_v22 = vld [vmem:[#allocation13 + $0x790] sm:$0xff]  ;;  %v1104_v23 = vld [vmem:[#allocation13 + $0x588] sm:$0xff]  ;;  %v1103_v25 = vld [vmem:[#allocation13 + $0x580] sm:$0xff] }
 0x161   :  { %1343 = vmatprep.subr.mxu0 %v1068_v27  ;;  %1414 = vmatprep.subr.mxu1 %v1132_v28  ;;  %v1168_v24 = vld [vmem:[#allocation13 + $0x788] sm:$0xff]  ;;  %v1167_v26 = vld [vmem:[#allocation13 + $0x780] sm:$0xff]  ;;  %v1102_v27 = vld [vmem:[#allocation13 + $0x578] sm:$0xff] }
 0x162   :  { %1344 = vmatpush1.msra.mxu0 %v1067_v29  ;;  %1415 = vmatpush1.msra.mxu1 %v1131_v30  ;;  %v1166_v28 = vld [vmem:[#allocation13 + $0x778] sm:$0xff]  ;;  %v1101_v29 = vld [vmem:[#allocation13 + $0x570] sm:$0xff] }
 0x163   :  { %1345 = vmatprep.subr.mxu0 %v1066_v31  ;;  %1416 = vmatprep.subr.mxu1 %v1130_v32  ;;  %v1165_v30 = vld [vmem:[#allocation13 + $0x770] sm:$0xff]  ;;  %v1100_v31 = vld [vmem:[#allocation13 + $0x568] sm:$0xff] }
 0x164   :  { %1346 = vmatpush1.msra.mxu0 %v1065_v33  ;;  %1417 = vmatpush1.msra.mxu1 %v1129_v35  ;;  %v1164_v32 = vld [vmem:[#allocation13 + $0x768] sm:$0xff]  ;;  %v1099_v33 = vld [vmem:[#allocation13 + $0x560] sm:$0xff] }
 0x165   :  { %1347 = vmatprep.subr.mxu0 %v1064_v36  ;;  %1418 = vmatprep.subr.mxu1 %v1128_v37  ;;  %v1163_v35 = vld [vmem:[#allocation13 + $0x760] sm:$0xff]  ;;  %v1098_v36 = vld [vmem:[#allocation13 + $0x558] sm:$0xff] }
 0x166   :  { %1348 = vmatpush1.msra.mxu0 %v1063_v38  ;;  %1419 = vmatpush1.msra.mxu1 %v1127_v39  ;;  %v1162_v37 = vld [vmem:[#allocation13 + $0x758] sm:$0xff]  ;;  %v1097_v38 = vld [vmem:[#allocation13 + $0x550] sm:$0xff] }
 0x167   :  { %1349 = vmatprep.subr.mxu0 %v1062_v40  ;;  %1420 = vmatprep.subr.mxu1 %v1126_v41  ;;  %v1161_v39 = vld [vmem:[#allocation13 + $0x750] sm:$0xff]  ;;  %v1096_v40 = vld [vmem:[#allocation13 + $0x548] sm:$0xff] }
 0x168   :  { %1350 = vmatpush1.msra.mxu0 %v1061_v42  ;;  %1421 = vmatpush1.msra.mxu1 %v1125_v34  ;;  %v1160_v41 = vld [vmem:[#allocation13 + $0x748] sm:$0xff]  ;;  %v1095_v42 = vld [vmem:[#allocation13 + $0x540] sm:$0xff] }
 0x169   :  { %1351 = vmatprep.subr.mxu0 %v1060_v44  ;;  %1422 = vmatprep.subr.mxu1 %v1124_v45  ;;  %v1159_v34 = vld [vmem:[#allocation13 + $0x740] sm:$0xff]  ;;  %v1094_v44 = vld [vmem:[#allocation13 + $0x538] sm:$0xff] }
 0x16a   :  { %1352 = vmatpush1.msra.mxu0 %v1059_v48  ;;  %1423 = vmatpush1.msra.mxu1 %v1123_v49  ;;  %v1158_v45 = vld [vmem:[#allocation13 + $0x738] sm:$0xff]  ;;  %v1093_v48 = vld [vmem:[#allocation13 + $0x530] sm:$0xff] }
 0x16b   :  { %1353 = vmatprep.subr.mxu0 %v1058_v51  ;;  %1424 = vmatprep.subr.mxu1 %v1122_v52  ;;  %v1157_v49 = vld [vmem:[#allocation13 + $0x730] sm:$0xff]  ;;  %v1092_v51 = vld [vmem:[#allocation13 + $0x528] sm:$0xff] }
 0x16c   :  { %1354 = vmatpush1.msra.mxu0 %v1057_v54  ;;  %1425 = vmatpush1.msra.mxu1 %v1121_v55  ;;  %v1156_v52 = vld [vmem:[#allocation13 + $0x728] sm:$0xff]  ;;  %v1091_v54 = vld [vmem:[#allocation13 + $0x520] sm:$0xff] }
 0x16d   :  { %1355 = vmatprep.subr.mxu0 %v1056_v43  ;;  %1426 = vmatprep.subr.mxu1 %v1120_v56  ;;  %v1155_v55 = vld [vmem:[#allocation13 + $0x720] sm:$0xff]  ;;  %v1090_v43 = vld [vmem:[#allocation13 + $0x518] sm:$0xff] }
 0x16e   :  { %1356 = vmatpush1.msra.mxu0 %v1055_v57  ;;  %1427 = vmatpush1.msra.mxu1 %v1119_v58  ;;  %v1154_v56 = vld [vmem:[#allocation13 + $0x718] sm:$0xff]  ;;  %v1089_v57 = vld [vmem:[#allocation13 + $0x510] sm:$0xff] }
 0x16f   :  { %1357 = vmatprep.subr.mxu0 %v1118_v50  ;;  %1428 = vmatprep.subr.mxu1 %v1182_v63  ;;  %v1153_v58 = vld [vmem:[#allocation13 + $0x710] sm:$0xff]  ;;  %v1088_v50 = vld [vmem:[#allocation13 + $0x508] sm:$0xff] }
 0x170   :  { %1358 = vmatpush2.msra.mxu0 %v1117_v46  ;;  %1429 = vmatpush2.msra.mxu1 %v1181_v47  ;;  %v1152_v63 = vld [vmem:[#allocation13 + $0x708] sm:$0xff]  ;;  %v1087_v46 = vld [vmem:[#allocation13 + $0x500] sm:$0xff] }
 0x171   :  { %1359 = vmatprep.subr.mxu0 %v1116_v0  ;;  %1430 = vmatprep.subr.mxu1 %v1180_v2  ;;  %v1151_v47 = vld [vmem:[#allocation13 + $0x700] sm:$0xff]  ;;  %v923_v0 = vmax.f32 %v1870_v59, 0.0  ;;  %v925_v2 = vmax.f32 %v1873_v61, 0.0  ;;  %v1481_v59 = vld [vmem:[%s1903_s8] sm:$0x3] }
 0x172   :  { %1360 = vmatpush2.msra.mxu0 %v1115_v3  ;;  %1431 = vmatpush2.msra.mxu1 %v1179_v4 }
 0x173   :  { %1361 = vmatprep.subr.mxu0 %v1114_v5  ;;  %1432 = vmatprep.subr.mxu1 %v1178_v6 }
 0x174   :  { %1362 = vmatpush2.msra.mxu0 %v1113_v53  ;;  %1433 = vmatpush2.msra.mxu1 %v1177_v1  ;;  %v1467_v53 = vld [vmem:[%s1902_s7] sm:$0x3] }
 0x175   :  { %1363 = vmatprep.subr.mxu0 %v1112_v7  ;;  %1434 = vmatprep.subr.mxu1 %v1176_v8 }
 0x176   :  { %1364 = vmatpush2.msra.mxu0 %v1111_v9  ;;  %1435 = vmatpush2.msra.mxu1 %v1175_v10  ;;  %v1472_v10 = vrot.slane %v1467_v53, %v1842_v60 }
 0x177   :  { %1365 = vmatprep.subr.mxu0 %v1110_v11  ;;  %1436 = vmatprep.subr.mxu1 %v1174_v12 }
 0x178   :  { %1366 = vmatpush2.msra.mxu0 %v1109_v13  ;;  %1437 = vmatpush2.msra.mxu1 %v1173_v14  ;;  %v1486_v13 = vrot.slane %v1481_v59, %v1842_v60 }
 0x179   :  { %1367 = vmatprep.subr.mxu0 %v1108_v15  ;;  %1438 = vmatprep.subr.mxu1 %v1172_v16  ;;  %v1476_v15 = vrot.slane %v1467_v53, %v1846_v62 }
 0x17a   :  { %1368 = vmatpush2.msra.mxu0 %v1107_v17  ;;  %1439 = vmatpush2.msra.mxu1 %v1171_v18  ;;  %v1497_v17 = vld [vmem:[%s1904_s9] sm:$0x3] }
 0x17b   :  { %1369 = vmatprep.subr.mxu0 %v1106_v19  ;;  %1440 = vmatprep.subr.mxu1 %v1170_v20  ;;  %v1490_v20 = vrot.slane %v1481_v59, %v1846_v62 }
 0x17c   :  { %1370 = vmatpush2.msra.mxu0 %v1105_v21  ;;  %1441 = vmatpush2.msra.mxu1 %v1169_v22 }
 0x17d   :  { %1371 = vmatprep.subr.mxu0 %v1104_v23  ;;  %1442 = vmatprep.subr.mxu1 %v1168_v24  ;;  %v1502_v23 = vrot.slane %v1497_v17, %v1842_v60 }
 0x17e   :  { %1372 = vmatpush2.msra.mxu0 %v1103_v25  ;;  %1443 = vmatpush2.msra.mxu1 %v1167_v26  ;;  %v1506_v26 = vrot.slane %v1497_v17, %v1846_v62 }
 0x17f   :  { %1373 = vmatprep.subr.mxu0 %v1102_v27  ;;  %1444 = vmatprep.subr.mxu1 %v1166_v28 }
 0x180   :  { %1374 = vmatpush2.msra.mxu0 %v1101_v29  ;;  %1445 = vmatpush2.msra.mxu1 %v1165_v30 }
 0x181   :  { %1375 = vmatprep.subr.mxu0 %v1100_v31  ;;  %1446 = vmatprep.subr.mxu1 %v1164_v32 }
 0x182   :  { %1376 = vmatpush2.msra.mxu0 %v1099_v33  ;;  %1447 = vmatpush2.msra.mxu1 %v1163_v35  ;;  %v1549_v33 = vld [vmem:[#allocation4] ss:$0 sm:$0xff] }
 0x183   :  { %1377 = vmatprep.subr.mxu0 %v1098_v36  ;;  %1448 = vmatprep.subr.mxu1 %v1162_v37 }
 0x184   :  { %1378 = vmatpush2.msra.mxu0 %v1097_v38  ;;  %1449 = vmatpush2.msra.mxu1 %v1161_v39 }
 0x185   :  { %1379 = vmatprep.subr.mxu0 %v1096_v40  ;;  %1450 = vmatprep.subr.mxu1 %v1160_v41 }
 0x186   :  { %1380 = vmatpush2.msra.mxu0 %v1095_v42  ;;  %1451 = vmatpush2.msra.mxu1 %v1159_v34 }
 0x187   :  { %1381 = vmatprep.subr.mxu0 %v1094_v44  ;;  %1452 = vmatprep.subr.mxu1 %v1158_v45 }
 0x188   :  { %1382 = vmatpush2.msra.mxu0 %v1093_v48  ;;  %1453 = vmatpush2.msra.mxu1 %v1157_v49 }
 0x189   :  { %1383 = vmatprep.subr.mxu0 %v1092_v51  ;;  %1454 = vmatprep.subr.mxu1 %v1156_v52 }
 0x18a   :  { %1384 = vmatpush2.msra.mxu0 %v1091_v54  ;;  %1455 = vmatpush2.msra.mxu1 %v1155_v55 }
 0x18b   :  { %1385 = vmatprep.subr.mxu0 %v1090_v43  ;;  %1456 = vmatprep.subr.mxu1 %v1154_v56 }
 0x18c   :  { %1386 = vmatpush2.msra.mxu0 %v1089_v57  ;;  %1457 = vmatpush2.msra.mxu1 %v1153_v58 }
 0x18d   :  { %1387 = vmatprep.subr.mxu0 %v1088_v50  ;;  %1458 = vmatprep.subr.mxu1 %v1152_v63 }
 0x18e   :  { %1388 = vmatpush2.msra.mxu0 %v1087_v46  ;;  %1459 = vmatpush2.msra.mxu1 %v1151_v47 }
 0x18f   :  { %1390 = vmatmul.mubr.f32.vlgmr.msra.gmra.mxu0 %v923_v0  ;;  %1461 = vmatmul.mubr.f32.vlgmr.msra.gmra.mxu1 %v925_v2 }
 0x20d   :  { %v1249_v3 = vpop.f32.mrf.mxu0  ;;  %v1320_v4 = vpop.f32.mrf.mxu1 }
 0x20e   :  { %v1321_v1 = vadd.f32 %v1320_v4, %v1249_v3 }
 0x20f   :  { %v1251_v5 = vpop.f32.mrf.mxu0  ;;  %v1322_v6 = vpop.f32.mrf.mxu1 }
 0x210   :  { %v1323_v61 = vadd.f32 %v1322_v6, %v1251_v5 }
 0x24f   :  { %v1391_v7 = vpop.f32.mrf.mxu0  ;;  %v1462_v8 = vpop.f32.mrf.mxu1 }
 0x250   :  { %v1392_v9 = vadd.f32 %v1391_v7, %v1321_v1 }
 0x251   :  { %v1393_v11 = vpop.f32.mrf.mxu0  ;;  %v1464_v16 = vpop.f32.mrf.mxu1 }
 0x252   :  { %v1463_v12 = vadd.f32 %v1462_v8, %v1392_v9  ;;  %v1394_v14 = vadd.f32 %v1393_v11, %v1323_v61 }
 0x254   :  { %v1479_v18 = vmul.f32 %v1472_v10, %v1463_v12  ;;  %v1465_v19 = vadd.f32 %v1464_v16, %v1394_v14 }
 0x256   :  { %v1493_v21 = vadd.f32 %v1486_v13, %v1479_v18  ;;  %v1480_v22 = vmul.f32 %v1476_v15, %v1465_v19 }
 0x258   :  { %v1494_v24 = vadd.f32 %v1490_v20, %v1480_v22  ;;  %v1495_v25 = vmax.f32 %v1493_v21, 0.0 }
 0x25a   :  { %v1496_v27 = vmax.f32 %v1494_v24, 0.0  ;;  %v1509_v28 = vmul.f32 %v1502_v23, %v1495_v25 }
 0x25c   :  { %v1510_v29 = vmul.f32 %v1506_v26, %v1496_v27  ;;  %v1512_v30 = vsel %vm1511_vm3, %v1509_v28, 0.0 }
 0x25e   :  { %v1513_v31 = vsel %vm1511_vm3, %v1510_v29, 0.0 }
 0x25f   :  { %v1514_v32 = vadd.f32 %v1513_v31, %v1512_v30 }
 0x261   :  { %1515 = vadd.xlane.f32.xlu0 %v1514_v32 }
 0x2ea   :  { %v1516_v35 = vpop.xlane.xlu0 %1515 }
 0x2eb   :  { %v1524_v36 = vadd.f32 %v1549_v33, %v1516_v35 }
 0x2ed   :  { %v1550_v37 = vmul.f32 -1.442695, %v1524_v36 }
 0x2ef   :  { %1564 = vpow2.f32 %v1550_v37 }
 0x2fc   :  { %v1565_v38 = vpop.eup %1564 }
 0x2fd   :  { %v1528_v39 = vadd.f32 1.0, %v1565_v38 }
 0x2ff   :  { %1566 = vrcp.f32 %v1528_v39 }
 0x30c   :  { %v1567_v60 = vpop.eup %1566 }
 0x30d   :  { %1532 = vst.msk [vmem:[%s1906_s11] sm:$0x3] %vm1531_vm4, %v1567_v60 }
 0x30e   :  { %1537 = vsyncpa [#allocation6], 1 }
 0x30f   :  { %1538 = vsyncpa [#allocation8], 1 }
 0x310   :  { %1539 = vsyncpa [#allocation11], 1 }
 0x311   :  { %1540 = vsyncpa [#allocation14], 1 }

</bundles_post_ra>
